<compile_context>
chip_gen: v5e
topology: v5e:2x2
jax: 0.10.0
libtpu: 0.0.40
codegen_flags: <defaults>
</compile_context>

<pallas_src>
import functools
import math
from dataclasses import dataclass, field

import numpy as np
import jax
import jax.numpy as jnp
from jax.experimental import pallas as pl
from jax.experimental.pallas import tpu as pltpu


# ---------------- config (toy-sized, consistent with the module) ----------------

@dataclass
class ToyLlamaConfig:
    vocab_size: int = 256
    max_position_embeddings: int = 131072
    hidden_size: int = 64
    intermediate_size: int = 128
    num_hidden_layers: int = 2
    num_attention_heads: int = 4
    num_key_value_heads: int = 2
    head_dim: int = 16
    rope_theta: float = 500000.0
    rope_scaling: dict = field(default_factory=lambda: {
        'factor': 8.0, 'high_freq_factor': 4.0, 'low_freq_factor': 1.0,
        'original_max_position_embeddings': 8192, 'rope_type': 'llama3'})


RMS_EPS = 1e-6  # matches RMSNorm default eps in the PyTorch module


# ---------------- shared math ----------------

def _rmsnorm_f32(x, w, eps=RMS_EPS):
    # x: [T, H] f32, w: [.., H] any dtype
    var = jnp.mean(x * x, axis=-1, keepdims=True)
    return x * jax.lax.rsqrt(var + eps) * w.astype(jnp.float32)


# ---------------- the single fused Pallas kernel ----------------

def _toy_llama_kernel(x_emb_ref, seg_row_ref, seg_col_ref,
                      cos_ref, slo_ref, shi_ref,
                      attn_nw_ref, wqkv_ref, wo_ref,
                      ffn_nw_ref, wgu_ref, wd_ref,
                      final_nw_ref, wlm_ref,
                      logits_ref,
                      x_acc, bias_s,
                      *, eps, num_q_heads, num_kv_heads, head_dim,
                      intermediate_size):
    """One grid step == one transformer layer; last step also runs the LM head."""
    layer = pl.program_id(0)
    Hq, Hkv, D = num_q_heads, num_kv_heads, head_dim
    group = Hq // Hkv
    I = intermediate_size
    T = x_acc.shape[0]
    half = D // 2

    @pl.when(layer == 0)
    def _init():
        # fp32 residual stream, resident in VMEM across the whole layer grid.
        x_acc[...] = x_emb_ref[...].astype(jnp.float32)
        # Causal + segment additive mask built in-kernel (no [T,T] HBM traffic).
        row = jax.lax.broadcasted_iota(jnp.int32, (T, T), 0)
        col = jax.lax.broadcasted_iota(jnp.int32, (T, T), 1)
        ok = (seg_row_ref[...] == seg_col_ref[...]) & (col <= row)
        bias_s[...] = jnp.where(ok, 0.0, -1e30).astype(jnp.float32)

    # ---------------- attention block ----------------
    x = x_acc[...]                                              # [T, H] f32
    xn = _rmsnorm_f32(x, attn_nw_ref[0], eps)
    qkv = jnp.dot(xn.astype(jnp.bfloat16), wqkv_ref[0],
                  preferred_element_type=jnp.float32)           # [T, (Hq+2Hkv)*D]

    # Slab-wide RoPE over the fused q|k|v projection.  rotate_half is realised
    # with two whole-slab rolls; cross-head / cross-slab wrap positions are
    # zero-masked in the sin tables, and the v region has cos==1, sin==0.
    rot_m = jnp.roll(qkv, -half, axis=1)    # column j -> qkv[:, j + D/2]
    rot_p = jnp.roll(qkv, half, axis=1)     # column j -> qkv[:, j - D/2]
    qkv_r = qkv * cos_ref[...] + rot_m * slo_ref[...] + rot_p * shi_ref[...]
    qkv_b = qkv_r.astype(jnp.bfloat16)

    bias = bias_s[...]
    wo = wo_ref[0]                                              # [Hq*D, H] bf16
    q_off, k_off, v_off = 0, Hq * D, (Hq + Hkv) * D

    acc = x                                                     # residual accumulator (f32)
    for g in range(Hkv):
        k_g = qkv_b[:, k_off + g * D: k_off + (g + 1) * D]      # [T, D]
        v_g = qkv_b[:, v_off + g * D: v_off + (g + 1) * D]      # [T, D]
        for j in range(group):
            h = g * group + j
            q_h = qkv_b[:, q_off + h * D: q_off + (h + 1) * D]  # scale folded into wq
            s = jax.lax.dot_general(q_h, k_g, (((1,), (1,)), ((), ())),
                                    preferred_element_type=jnp.float32)   # [T, T]
            s = s + bias
            m = jnp.max(s, axis=-1, keepdims=True)
            p = jnp.exp(s - m)                                  # unnormalized
            lsum = jnp.sum(p, axis=-1, keepdims=True)
            pv = jnp.dot(p.astype(jnp.bfloat16), v_g,
                         preferred_element_type=jnp.float32)    # [T, D]
            o_h = (pv * pl.reciprocal(lsum, approx=True)).astype(jnp.bfloat16)
            # accumulate straight into the residual: no head-output concatenate
            acc = acc + jnp.dot(o_h, wo[h * D:(h + 1) * D, :],
                                preferred_element_type=jnp.float32)

    # ---------------- FFN block ----------------
    xn2 = _rmsnorm_f32(acc, ffn_nw_ref[0], eps)
    gu = jnp.dot(xn2.astype(jnp.bfloat16), wgu_ref[0],
                 preferred_element_type=jnp.float32)            # [T, 2I]
    gg = gu[:, :I]
    uu = gu[:, I:]
    hh = (gg * jax.nn.sigmoid(gg) * uu).astype(jnp.bfloat16)    # SiLU(g) * u
    x_out = acc + jnp.dot(hh, wd_ref[0], preferred_element_type=jnp.float32)
    x_acc[...] = x_out                                          # single store / layer

    # ---------------- final norm + lm head (last layer only) ----------------
    @pl.when(layer == pl.num_programs(0) - 1)
    def _head():
        xf = _rmsnorm_f32(x_acc[...], final_nw_ref[...], eps)
        logits_ref[...] = jnp.dot(xf.astype(jnp.bfloat16), wlm_ref[...],
                                  preferred_element_type=jnp.float32)


# ---------------- host-side glue: varlen seg/pos + RoPE tables ----------------

def seg_and_pos(cu_seqlens):
    T = int(cu_seqlens[-1])
    seg = np.zeros((T,), np.int32)
    pos = np.zeros((T,), np.int32)
    for s in range(len(cu_seqlens) - 1):
        a, b = int(cu_seqlens[s]), int(cu_seqlens[s + 1])
        seg[a:b] = s
        pos[a:b] = np.arange(b - a, dtype=np.int32)
    return seg, pos


def llama3_inv_freq(head_dim, theta, scaling):
    inv_freq = 1.0 / (theta ** (np.arange(0, head_dim, 2, dtype=np.float64) / head_dim))
    factor = scaling['factor']
    low = scaling['low_freq_factor']
    high = scaling['high_freq_factor']
    old_ctx = scaling['original_max_position_embeddings']
    low_wl = old_ctx / low
    high_wl = old_ctx / high
    wavelen = 2.0 * np.pi / inv_freq
    inv_llama = np.where(wavelen > low_wl, inv_freq / factor, inv_freq)
    smooth = (old_ctx / wavelen - low) / (high - low)
    smoothed = (1.0 - smooth) / factor * inv_freq + smooth * inv_freq
    med = (wavelen >= high_wl) & (wavelen <= low_wl)
    return np.where(med, smoothed, inv_llama).astype(np.float32)


def rope_base_tables(positions, cfg: ToyLlamaConfig):
    inv = llama3_inv_freq(cfg.head_dim, cfg.rope_theta, cfg.rope_scaling)   # [D/2]
    freqs = np.outer(positions.astype(np.float32), inv)                     # [T, D/2]
    emb = np.concatenate([freqs, freqs], axis=-1)                           # [T, D]
    return np.cos(emb).astype(np.float32), np.sin(emb).astype(np.float32)


def rope_slab_tables(positions, cfg: ToyLlamaConfig):
    """cos / sin_lo / sin_hi tables tiled over the fused [q|k|v] slab width so
    the kernel can apply RoPE in one slab-wide pass (v columns pass through)."""
    D = cfg.head_dim
    Hq, Hkv = cfg.num_attention_heads, cfg.num_key_value_heads
    half = D // 2
    T = positions.shape[0]
    cos, sin = rope_base_tables(positions, cfg)                  # [T, D]
    zeros = np.zeros((T, half), np.float32)
    slo = np.concatenate([-sin[:, :half], zeros], axis=-1)       # used with roll(-D/2)
    shi = np.concatenate([zeros, sin[:, half:]], axis=-1)        # used with roll(+D/2)
    n_rope = Hq + Hkv
    v_w = Hkv * D
    cos_full = np.concatenate([np.tile(cos, (1, n_rope)),
                               np.ones((T, v_w), np.float32)], axis=-1)
    slo_full = np.concatenate([np.tile(slo, (1, n_rope)),
                               np.zeros((T, v_w), np.float32)], axis=-1)
    shi_full = np.concatenate([np.tile(shi, (1, n_rope)),
                               np.zeros((T, v_w), np.float32)], axis=-1)
    return (jnp.asarray(cos_full), jnp.asarray(slo_full), jnp.asarray(shi_full))


# ---------------- model: params + forward ----------------

def init_params(key, cfg: ToyLlamaConfig):
    H, I, V = cfg.hidden_size, cfg.intermediate_size, cfg.vocab_size
    Hq, Hkv, D = cfg.num_attention_heads, cfg.num_key_value_heads, cfg.head_dim
    L = cfg.num_hidden_layers
    assert Hq % Hkv == 0
    # NOTE: 1/sqrt(D) attention scale is folded into wq here; when importing a
    # real checkpoint, the same fold must be applied to q_proj weights.
    scale = 1.0 / math.sqrt(D)
    keys = jax.random.split(key, 2 + 7 * L)

    def w(k, shape):
        return jax.random.normal(k, shape, jnp.float32) * 0.02

    wqkv_l, wo_l, wgu_l, wd_l = [], [], [], []
    idx = 2
    for _ in range(L):
        wq = w(keys[idx + 0], (H, Hq * D)) * scale
        wk = w(keys[idx + 1], (H, Hkv * D))
        wv = w(keys[idx + 2], (H, Hkv * D))
        wo = w(keys[idx + 3], (Hq * D, H))
        wg = w(keys[idx + 4], (H, I))
        wu = w(keys[idx + 5], (H, I))
        wd = w(keys[idx + 6], (I, H))
        # fused [H, (Hq+2*Hkv)*D] = [64, 128] fills one 128-wide MXU pass
        wqkv_l.append(jnp.concatenate([wq, wk, wv], axis=1).astype(jnp.bfloat16))
        wo_l.append(wo.astype(jnp.bfloat16))
        # fused gate|up [H, 2*I] = [64, 256]
        wgu_l.append(jnp.concatenate([wg, wu], axis=1).astype(jnp.bfloat16))
        wd_l.append(wd.astype(jnp.bfloat16))
        idx += 7

    return {
        'embedding': jax.random.normal(keys[0], (V, H), jnp.float32) * 0.02,
        'lm_head_w': w(keys[1], (H, V)).astype(jnp.bfloat16),
        'final_norm_w': jnp.ones((H,), jnp.bfloat16),
        'attn_norm': jnp.ones((L, 1, H), jnp.bfloat16),
        'ffn_norm': jnp.ones((L, 1, H), jnp.bfloat16),
        'wqkv': jnp.stack(wqkv_l),        # [L, H, (Hq+2Hkv)*D]
        'wo': jnp.stack(wo_l),            # [L, Hq*D, H]
        'wgu': jnp.stack(wgu_l),          # [L, H, 2I]
        'wd': jnp.stack(wd_l),            # [L, I, H]
    }


def toy_llama_forward(params, cfg: ToyLlamaConfig, input_ids, cu_seqlens):
    Hq, Hkv, D = cfg.num_attention_heads, cfg.num_key_value_heads, cfg.head_dim
    H, I, V = cfg.hidden_size, cfg.intermediate_size, cfg.vocab_size
    L = cfg.num_hidden_layers
    QKV = (Hq + 2 * Hkv) * D

    seg, pos = seg_and_pos(cu_seqlens)
    T = int(pos.shape[0])
    cosf, slo, shi = rope_slab_tables(pos, cfg)
    seg_row = jnp.asarray(seg[:, None], jnp.int32)   # [T, 1]
    seg_col = jnp.asarray(seg[None, :], jnp.int32)   # [1, T]

    # embedding gather stays on the XLA side (cheap, data-dependent gather)
    x_emb = params['embedding'][input_ids].astype(jnp.bfloat16)   # [T, H]

    kernel = functools.partial(
        _toy_llama_kernel, eps=RMS_EPS, num_q_heads=Hq, num_kv_heads=Hkv,
        head_dim=D, intermediate_size=I)

    logits = pl.pallas_call(
        kernel,
        out_shape=jax.ShapeDtypeStruct((T, V), jnp.float32),
        grid=(L,),
        in_specs=[
            pl.BlockSpec((T, H), lambda l: (0, 0)),              # x_emb
            pl.BlockSpec((T, 1), lambda l: (0, 0)),              # seg_row
            pl.BlockSpec((1, T), lambda l: (0, 0)),              # seg_col
            pl.BlockSpec((T, QKV), lambda l: (0, 0)),            # cos (slab)
            pl.BlockSpec((T, QKV), lambda l: (0, 0)),            # sin_lo (slab)
            pl.BlockSpec((T, QKV), lambda l: (0, 0)),            # sin_hi (slab)
            pl.BlockSpec((1, 1, H), lambda l: (l, 0, 0)),        # attn_norm[l]
            pl.BlockSpec((1, H, QKV), lambda l: (l, 0, 0)),      # wqkv[l]
            pl.BlockSpec((1, Hq * D, H), lambda l: (l, 0, 0)),   # wo[l]
            pl.BlockSpec((1, 1, H), lambda l: (l, 0, 0)),        # ffn_norm[l]
            pl.BlockSpec((1, H, 2 * I), lambda l: (l, 0, 0)),    # wgu[l]
            pl.BlockSpec((1, I, H), lambda l: (l, 0, 0)),        # wd[l]
            pl.BlockSpec((1, H), lambda l: (0, 0)),              # final_norm
            pl.BlockSpec((H, V), lambda l: (0, 0)),              # lm_head
        ],
        out_specs=pl.BlockSpec((T, V), lambda l: (0, 0)),
        scratch_shapes=[
            pltpu.VMEM((T, H), jnp.float32),    # fp32 residual stream
            pltpu.VMEM((T, T), jnp.float32),    # causal+segment additive mask
        ],
        compiler_params=pltpu.CompilerParams(
            dimension_semantics=("arbitrary",)),   # layer axis is sequential
    )(x_emb, seg_row, seg_col, cosf, slo, shi,
      params['attn_norm'], params['wqkv'], params['wo'],
      params['ffn_norm'], params['wgu'], params['wd'],
      params['final_norm_w'].reshape(1, H), params['lm_head_w'])
    return logits                                                 # [T, V] f32


# ---------------- pure-JAX reference (validates the kernel) ----------------

def reference_forward(params, cfg: ToyLlamaConfig, input_ids, cu_seqlens):
    """Plain jnp mirror using the standard per-head rotate_half RoPE and a
    host-built mask — independent check of the slab/roll RoPE trick, the
    in-kernel mask, and the stacked-weight layer grid."""
    Hq, Hkv, D = cfg.num_attention_heads, cfg.num_key_value_heads, cfg.head_dim
    I = cfg.intermediate_size
    group = Hq // Hkv
    seg, pos = seg_and_pos(cu_seqlens)
    T = int(pos.shape[0])
    cos_np, sin_np = rope_base_tables(pos, cfg)
    cos, sin = jnp.asarray(cos_np), jnp.asarray(sin_np)
    causal = np.arange(T)[:, None] >= np.arange(T)[None, :]
    same = seg[:, None] == seg[None, :]
    bias = jnp.asarray(np.where(same & causal, 0.0, -1e30), jnp.float32)

    def rope(t):                                   # [T, D] f32
        t1, t2 = t[:, :D // 2], t[:, D // 2:]
        rot = jnp.concatenate([-t2, t1], axis=-1)
        return t * cos + rot * sin

    x = params['embedding'][input_ids].astype(jnp.bfloat16).astype(jnp.float32)
    for li in range(cfg.num_hidden_layers):
        wqkv, wo = params['wqkv'][li], params['wo'][li]
        wgu, wd = params['wgu'][li], params['wd'][li]
        xn = _rmsnorm_f32(x, params['attn_norm'][li, 0])
        qkv = jnp.dot(xn.astype(jnp.bfloat16), wqkv, preferred_element_type=jnp.float32)
        acc = x
        for g in range(Hkv):
            k_g = rope(qkv[:, (Hq + g) * D:(Hq + g + 1) * D]).astype(jnp.bfloat16)
            v_g = qkv[:, (Hq + Hkv + g) * D:(Hq + Hkv + g + 1) * D].astype(jnp.bfloat16)
            for j in range(group):
                h = g * group + j
                q_h = rope(qkv[:, h * D:(h + 1) * D]).astype(jnp.bfloat16)
                s = jnp.dot(q_h, k_g.T, preferred_element_type=jnp.float32) + bias
                m = jnp.max(s, axis=-1, keepdims=True)
                p = jnp.exp(s - m)
                lsum = jnp.sum(p, axis=-1, keepdims=True)
                pv = jnp.dot(p.astype(jnp.bfloat16), v_g, preferred_element_type=jnp.float32)
                o_h = (pv / lsum).astype(jnp.bfloat16)
                acc = acc + jnp.dot(o_h, wo[h * D:(h + 1) * D, :],
                                    preferred_element_type=jnp.float32)
        x = acc
        xn2 = _rmsnorm_f32(x, params['ffn_norm'][li, 0])
        gu = jnp.dot(xn2.astype(jnp.bfloat16), wgu, preferred_element_type=jnp.float32)
        gg, uu = gu[:, :I], gu[:, I:]
        hh = (gg * jax.nn.sigmoid(gg) * uu).astype(jnp.bfloat16)
        x = x + jnp.dot(hh, wd, preferred_element_type=jnp.float32)
    xf = _rmsnorm_f32(x, params['final_norm_w'])
    return jnp.dot(xf.astype(jnp.bfloat16), params['lm_head_w'],
                   preferred_element_type=jnp.float32)


# ---------------- main ----------------

if __name__ == "__main__":
    cfg = ToyLlamaConfig()
    key = jax.random.PRNGKey(0)
    pkey, ikey = jax.random.split(key)
    params = init_params(pkey, cfg)

    # two packed sequences of lengths 10 and 6 (total T = 16)
    cu_seqlens = np.array([0, 10, 16], dtype=np.int32)
    T = int(cu_seqlens[-1])
    input_ids = jax.random.randint(ikey, (T,), 0, cfg.vocab_size, dtype=jnp.int32)

    logits = toy_llama_forward(params, cfg, input_ids, cu_seqlens)
    jax.block_until_ready(logits)
    assert logits.shape == (T, cfg.vocab_size)
    assert logits.dtype == jnp.float32
    assert bool(jnp.all(jnp.isfinite(logits)))

    ref = reference_forward(params, cfg, input_ids, cu_seqlens)
    err = float(jnp.max(jnp.abs(logits - ref)))
    assert err < 3e-2, f"max |pallas - reference| = {err}"

    print("KERNEL_OK")
</pallas_src>

<mosaic_0001>
module attributes {stable_mosaic.version = 11 : i64} {
  func.func @_toy_llama_kernel(%arg0: i32, %arg1: memref<16x64xbf16, #tpu.memory_space<vmem>>, %arg2: memref<16x1xi32, #tpu.memory_space<vmem>>, %arg3: memref<1x16xi32, #tpu.memory_space<vmem>>, %arg4: memref<16x128xf32, #tpu.memory_space<vmem>>, %arg5: memref<16x128xf32, #tpu.memory_space<vmem>>, %arg6: memref<16x128xf32, #tpu.memory_space<vmem>>, %arg7: memref<1x1x64xbf16, #tpu.memory_space<vmem>>, %arg8: memref<1x64x128xbf16, #tpu.memory_space<vmem>>, %arg9: memref<1x64x64xbf16, #tpu.memory_space<vmem>>, %arg10: memref<1x1x64xbf16, #tpu.memory_space<vmem>>, %arg11: memref<1x64x256xbf16, #tpu.memory_space<vmem>>, %arg12: memref<1x128x64xbf16, #tpu.memory_space<vmem>>, %arg13: memref<1x64xbf16, #tpu.memory_space<vmem>>, %arg14: memref<64x256xbf16, #tpu.memory_space<vmem>>, %arg15: memref<16x256xf32, #tpu.memory_space<vmem>>, %arg16: memref<16x64xf32, #tpu.memory_space<vmem>>, %arg17: memref<16x16xf32, #tpu.memory_space<vmem>>) attributes {dimension_semantics = [#tpu.dimension_semantics<arbitrary>], iteration_bounds = array<i64: 2>, scalar_prefetch = 0 : i64, scratch_operands = 2 : i64, tpu.core_type = #tpu.core_type<tc>, window_params = [{pipeline_mode = #tpu.pipeline_mode<synchronous>, transform_indices = @transform_0, window_bounds = array<i64: 16, 64>}, {pipeline_mode = #tpu.pipeline_mode<synchronous>, transform_indices = @transform_1, window_bounds = array<i64: 16, 1>}, {pipeline_mode = #tpu.pipeline_mode<synchronous>, transform_indices = @transform_2, window_bounds = array<i64: 1, 16>}, {pipeline_mode = #tpu.pipeline_mode<synchronous>, transform_indices = @transform_3, window_bounds = array<i64: 16, 128>}, {pipeline_mode = #tpu.pipeline_mode<synchronous>, transform_indices = @transform_4, window_bounds = array<i64: 16, 128>}, {pipeline_mode = #tpu.pipeline_mode<synchronous>, transform_indices = @transform_5, window_bounds = array<i64: 16, 128>}, {transform_indices = @transform_6, window_bounds = array<i64: 1, 1, 64>}, {transform_indices = @transform_7, window_bounds = array<i64: 1, 64, 128>}, {transform_indices = @transform_8, window_bounds = array<i64: 1, 64, 64>}, {transform_indices = @transform_9, window_bounds = array<i64: 1, 1, 64>}, {transform_indices = @transform_10, window_bounds = array<i64: 1, 64, 256>}, {transform_indices = @transform_11, window_bounds = array<i64: 1, 128, 64>}, {pipeline_mode = #tpu.pipeline_mode<synchronous>, transform_indices = @transform_12, window_bounds = array<i64: 1, 64>}, {pipeline_mode = #tpu.pipeline_mode<synchronous>, transform_indices = @transform_13, window_bounds = array<i64: 64, 256>}, {pipeline_mode = #tpu.pipeline_mode<synchronous>, transform_indices = @transform_14, window_bounds = array<i64: 16, 256>}]} {
    %c0_i32 = arith.constant 0 : i32
    %0 = arith.cmpi eq, %arg0, %c0_i32 : i32
    %1 = arith.extui %0 : i1 to i32
    %c0_i32_0 = arith.constant 0 : i32
    %2 = arith.cmpi ne, %1, %c0_i32_0 : i32
    scf.if %2 {
      %c0_60 = arith.constant 0 : index
      %c0_61 = arith.constant 0 : index
      %158 = vector.load %arg1[%c0_60, %c0_61] : memref<16x64xbf16, #tpu.memory_space<vmem>>, vector<16x64xbf16>
      %159 = arith.extf %158 : vector<16x64xbf16> to vector<16x64xf32>
      %c0_62 = arith.constant 0 : index
      %c0_63 = arith.constant 0 : index
      %160 = vector.load %arg16[%c0_62, %c0_63] : memref<16x64xf32, #tpu.memory_space<vmem>>, vector<16x64xf32>
      tpu.vector_store %arg16[%c0_62, %c0_63], %159 {strides = array<i32>} : memref<16x64xf32, #tpu.memory_space<vmem>>, vector<16x64xf32>,
      %161 = tpu.iota {dimensions = array<i32: 0>} : vector<16x16xi32>
      %162 = tpu.iota {dimensions = array<i32: 1>} : vector<16x16xi32>
      %c0_64 = arith.constant 0 : index
      %c0_65 = arith.constant 0 : index
      %163 = vector.load %arg2[%c0_64, %c0_65] : memref<16x1xi32, #tpu.memory_space<vmem>>, vector<16x1xi32>
      %c0_66 = arith.constant 0 : index
      %c0_67 = arith.constant 0 : index
      %164 = vector.load %arg3[%c0_66, %c0_67] : memref<1x16xi32, #tpu.memory_space<vmem>>, vector<1x16xi32>
      %165 = vector.broadcast %163 : vector<16x1xi32> to vector<16x16xi32>
      %166 = vector.broadcast %164 : vector<1x16xi32> to vector<16x16xi32>
      %167 = arith.cmpi eq, %165, %166 : vector<16x16xi32>
      %168 = arith.cmpi sle, %162, %161 : vector<16x16xi32>
      %169 = arith.andi %167, %168 : vector<16x16xi1>
      %cst_68 = arith.constant 0.000000e+00 : f32
      %cst_69 = arith.constant -1.000000e+30 : f32
      %170 = vector.broadcast %cst_68 : f32 to vector<16x16xf32>
      %171 = vector.broadcast %cst_69 : f32 to vector<16x16xf32>
      %172 = arith.select %169, %170, %171 : vector<16x16xi1>, vector<16x16xf32>
      %c0_70 = arith.constant 0 : index
      %c0_71 = arith.constant 0 : index
      %173 = vector.load %arg17[%c0_70, %c0_71] : memref<16x16xf32, #tpu.memory_space<vmem>>, vector<16x16xf32>
      tpu.vector_store %arg17[%c0_70, %c0_71], %172 {strides = array<i32>} : memref<16x16xf32, #tpu.memory_space<vmem>>, vector<16x16xf32>,
    } else {
    }
    %c0 = arith.constant 0 : index
    %c0_1 = arith.constant 0 : index
    %3 = vector.load %arg16[%c0, %c0_1] : memref<16x64xf32, #tpu.memory_space<vmem>>, vector<16x64xf32>
    %c0_2 = arith.constant 0 : index
    %c0_3 = arith.constant 0 : index
    %c0_4 = arith.constant 0 : index
    %4 = vector.load %arg7[%c0_2, %c0_3, %c0_4] : memref<1x1x64xbf16, #tpu.memory_space<vmem>>, vector<1x1x64xbf16>
    %5 = vector.shape_cast %4 : vector<1x1x64xbf16> to vector<1x64xbf16>
    %6 = arith.mulf %3, %3 : vector<16x64xf32>
    %cst = arith.constant dense<0.000000e+00> : vector<16xf32>
    %7 = vector.multi_reduction <add>, %6, %cst [1] : vector<16x64xf32> to vector<16xf32>
    %8 = vector.shape_cast %7 : vector<16xf32> to vector<16x1xf32>
    %cst_5 = arith.constant 6.400000e+01 : f32
    %9 = vector.broadcast %cst_5 : f32 to vector<16x1xf32>
    %10 = arith.divf %8, %9 : vector<16x1xf32>
    %cst_6 = arith.constant 9.99999997E-7 : f32
    %11 = vector.broadcast %cst_6 : f32 to vector<16x1xf32>
    %12 = arith.addf %10, %11 : vector<16x1xf32>
    %13 = math.rsqrt %12 : vector<16x1xf32>
    %14 = vector.broadcast %13 : vector<16x1xf32> to vector<16x64xf32>
    %15 = arith.mulf %3, %14 : vector<16x64xf32>
    %16 = arith.extf %5 : vector<1x64xbf16> to vector<1x64xf32>
    %17 = vector.broadcast %16 : vector<1x64xf32> to vector<16x64xf32>
    %18 = arith.mulf %15, %17 : vector<16x64xf32>
    %19 = arith.truncf %18 : vector<16x64xf32> to vector<16x64xbf16>
    %c0_7 = arith.constant 0 : index
    %c0_8 = arith.constant 0 : index
    %c0_9 = arith.constant 0 : index
    %20 = vector.load %arg8[%c0_7, %c0_8, %c0_9] : memref<1x64x128xbf16, #tpu.memory_space<vmem>>, vector<1x64x128xbf16>
    %21 = vector.shape_cast %20 : vector<1x64x128xbf16> to vector<64x128xbf16>
    %cst_10 = arith.constant dense<0.000000e+00> : vector<16x128xf32>
    %22 = tpu.matmul %19, %21, %cst_10 {dimension_numbers = #tpu.dot_dimension_numbers<[1], [0], [0], [1], [0, 0, 1, 1], [], []>} : vector<16x64xbf16>, vector<64x128xbf16>, vector<16x128xf32> -> vector<16x128xf32>
    %23 = vector.extract_strided_slice %22 {offsets = [0, 8], sizes = [16, 120], strides = [1, 1]} : vector<16x128xf32> to vector<16x120xf32>
    %24 = vector.extract_strided_slice %22 {offsets = [0, 0], sizes = [16, 8], strides = [1, 1]} : vector<16x128xf32> to vector<16x8xf32>
    %25 = tpu.concatenate %23, %24 in 1 : vector<16x120xf32>, vector<16x8xf32> -> vector<16x128xf32>
    %26 = vector.extract_strided_slice %22 {offsets = [0, 120], sizes = [16, 8], strides = [1, 1]} : vector<16x128xf32> to vector<16x8xf32>
    %27 = vector.extract_strided_slice %22 {offsets = [0, 0], sizes = [16, 120], strides = [1, 1]} : vector<16x128xf32> to vector<16x120xf32>
    %28 = tpu.concatenate %26, %27 in 1 : vector<16x8xf32>, vector<16x120xf32> -> vector<16x128xf32>
    %c0_11 = arith.constant 0 : index
    %c0_12 = arith.constant 0 : index
    %29 = vector.load %arg4[%c0_11, %c0_12] : memref<16x128xf32, #tpu.memory_space<vmem>>, vector<16x128xf32>
    %30 = arith.mulf %22, %29 : vector<16x128xf32>
    %c0_13 = arith.constant 0 : index
    %c0_14 = arith.constant 0 : index
    %31 = vector.load %arg5[%c0_13, %c0_14] : memref<16x128xf32, #tpu.memory_space<vmem>>, vector<16x128xf32>
    %32 = arith.mulf %25, %31 : vector<16x128xf32>
    %33 = arith.addf %30, %32 : vector<16x128xf32>
    %c0_15 = arith.constant 0 : index
    %c0_16 = arith.constant 0 : index
    %34 = vector.load %arg6[%c0_15, %c0_16] : memref<16x128xf32, #tpu.memory_space<vmem>>, vector<16x128xf32>
    %35 = arith.mulf %28, %34 : vector<16x128xf32>
    %36 = arith.addf %33, %35 : vector<16x128xf32>
    %37 = arith.truncf %36 : vector<16x128xf32> to vector<16x128xbf16>
    %c0_17 = arith.constant 0 : index
    %c0_18 = arith.constant 0 : index
    %38 = vector.load %arg17[%c0_17, %c0_18] : memref<16x16xf32, #tpu.memory_space<vmem>>, vector<16x16xf32>
    %c0_19 = arith.constant 0 : index
    %c0_20 = arith.constant 0 : index
    %c0_21 = arith.constant 0 : index
    %39 = vector.load %arg9[%c0_19, %c0_20, %c0_21] : memref<1x64x64xbf16, #tpu.memory_space<vmem>>, vector<1x64x64xbf16>
    %40 = vector.shape_cast %39 : vector<1x64x64xbf16> to vector<64x64xbf16>
    %41 = vector.extract_strided_slice %37 {offsets = [0, 64], sizes = [16, 16], strides = [1, 1]} : vector<16x128xbf16> to vector<16x16xbf16>
    %42 = vector.extract_strided_slice %37 {offsets = [0, 96], sizes = [16, 16], strides = [1, 1]} : vector<16x128xbf16> to vector<16x16xbf16>
    %43 = vector.extract_strided_slice %37 {offsets = [0, 0], sizes = [16, 16], strides = [1, 1]} : vector<16x128xbf16> to vector<16x16xbf16>
    %cst_22 = arith.constant dense<0.000000e+00> : vector<16x16xf32>
    %44 = tpu.matmul %43, %41, %cst_22 {dimension_numbers = #tpu.dot_dimension_numbers<[1], [1], [0], [0], [0, 0, 1, 0], [], []>} : vector<16x16xbf16>, vector<16x16xbf16>, vector<16x16xf32> -> vector<16x16xf32>
    %45 = arith.addf %44, %38 : vector<16x16xf32>
    %cst_23 = arith.constant dense<0xFF800000> : vector<16xf32>
    %46 = vector.multi_reduction <maximumf>, %45, %cst_23 [1] : vector<16x16xf32> to vector<16xf32>
    %47 = vector.shape_cast %46 : vector<16xf32> to vector<16x1xf32>
    %48 = vector.broadcast %47 : vector<16x1xf32> to vector<16x16xf32>
    %49 = arith.subf %45, %48 : vector<16x16xf32>
    %50 = math.exp %49 : vector<16x16xf32>
    %cst_24 = arith.constant dense<0.000000e+00> : vector<16xf32>
    %51 = vector.multi_reduction <add>, %50, %cst_24 [1] : vector<16x16xf32> to vector<16xf32>
    %52 = vector.shape_cast %51 : vector<16xf32> to vector<16x1xf32>
    %53 = arith.truncf %50 : vector<16x16xf32> to vector<16x16xbf16>
    %cst_25 = arith.constant dense<0.000000e+00> : vector<16x16xf32>
    %54 = tpu.matmul %53, %42, %cst_25 {dimension_numbers = #tpu.dot_dimension_numbers<[1], [0], [0], [1], [0, 0, 1, 1], [], []>} : vector<16x16xbf16>, vector<16x16xbf16>, vector<16x16xf32> -> vector<16x16xf32>
    %55 = tpu.reciprocal %52 {approx = true} : vector<16x1xf32> -> vector<16x1xf32>
    %56 = vector.broadcast %55 : vector<16x1xf32> to vector<16x16xf32>
    %57 = arith.mulf %54, %56 : vector<16x16xf32>
    %58 = arith.truncf %57 : vector<16x16xf32> to vector<16x16xbf16>
    %59 = vector.extract_strided_slice %40 {offsets = [0, 0], sizes = [16, 64], strides = [1, 1]} : vector<64x64xbf16> to vector<16x64xbf16>
    %cst_26 = arith.constant dense<0.000000e+00> : vector<16x64xf32>
    %60 = tpu.matmul %58, %59, %cst_26 {dimension_numbers = #tpu.dot_dimension_numbers<[1], [0], [0], [1], [0, 0, 1, 1], [], []>} : vector<16x16xbf16>, vector<16x64xbf16>, vector<16x64xf32> -> vector<16x64xf32>
    %61 = arith.addf %3, %60 : vector<16x64xf32>
    %62 = vector.extract_strided_slice %37 {offsets = [0, 16], sizes = [16, 16], strides = [1, 1]} : vector<16x128xbf16> to vector<16x16xbf16>
    %cst_27 = arith.constant dense<0.000000e+00> : vector<16x16xf32>
    %63 = tpu.matmul %62, %41, %cst_27 {dimension_numbers = #tpu.dot_dimension_numbers<[1], [1], [0], [0], [0, 0, 1, 0], [], []>} : vector<16x16xbf16>, vector<16x16xbf16>, vector<16x16xf32> -> vector<16x16xf32>
    %64 = arith.addf %63, %38 : vector<16x16xf32>
    %cst_28 = arith.constant dense<0xFF800000> : vector<16xf32>
    %65 = vector.multi_reduction <maximumf>, %64, %cst_28 [1] : vector<16x16xf32> to vector<16xf32>
    %66 = vector.shape_cast %65 : vector<16xf32> to vector<16x1xf32>
    %67 = vector.broadcast %66 : vector<16x1xf32> to vector<16x16xf32>
    %68 = arith.subf %64, %67 : vector<16x16xf32>
    %69 = math.exp %68 : vector<16x16xf32>
    %cst_29 = arith.constant dense<0.000000e+00> : vector<16xf32>
    %70 = vector.multi_reduction <add>, %69, %cst_29 [1] : vector<16x16xf32> to vector<16xf32>
    %71 = vector.shape_cast %70 : vector<16xf32> to vector<16x1xf32>
    %72 = arith.truncf %69 : vector<16x16xf32> to vector<16x16xbf16>
    %cst_30 = arith.constant dense<0.000000e+00> : vector<16x16xf32>
    %73 = tpu.matmul %72, %42, %cst_30 {dimension_numbers = #tpu.dot_dimension_numbers<[1], [0], [0], [1], [0, 0, 1, 1], [], []>} : vector<16x16xbf16>, vector<16x16xbf16>, vector<16x16xf32> -> vector<16x16xf32>
    %74 = tpu.reciprocal %71 {approx = true} : vector<16x1xf32> -> vector<16x1xf32>
    %75 = vector.broadcast %74 : vector<16x1xf32> to vector<16x16xf32>
    %76 = arith.mulf %73, %75 : vector<16x16xf32>
    %77 = arith.truncf %76 : vector<16x16xf32> to vector<16x16xbf16>
    %78 = vector.extract_strided_slice %40 {offsets = [16, 0], sizes = [16, 64], strides = [1, 1]} : vector<64x64xbf16> to vector<16x64xbf16>
    %cst_31 = arith.constant dense<0.000000e+00> : vector<16x64xf32>
    %79 = tpu.matmul %77, %78, %cst_31 {dimension_numbers = #tpu.dot_dimension_numbers<[1], [0], [0], [1], [0, 0, 1, 1], [], []>} : vector<16x16xbf16>, vector<16x64xbf16>, vector<16x64xf32> -> vector<16x64xf32>
    %80 = arith.addf %61, %79 : vector<16x64xf32>
    %81 = vector.extract_strided_slice %37 {offsets = [0, 80], sizes = [16, 16], strides = [1, 1]} : vector<16x128xbf16> to vector<16x16xbf16>
    %82 = vector.extract_strided_slice %37 {offsets = [0, 112], sizes = [16, 16], strides = [1, 1]} : vector<16x128xbf16> to vector<16x16xbf16>
    %83 = vector.extract_strided_slice %37 {offsets = [0, 32], sizes = [16, 16], strides = [1, 1]} : vector<16x128xbf16> to vector<16x16xbf16>
    %cst_32 = arith.constant dense<0.000000e+00> : vector<16x16xf32>
    %84 = tpu.matmul %83, %81, %cst_32 {dimension_numbers = #tpu.dot_dimension_numbers<[1], [1], [0], [0], [0, 0, 1, 0], [], []>} : vector<16x16xbf16>, vector<16x16xbf16>, vector<16x16xf32> -> vector<16x16xf32>
    %85 = arith.addf %84, %38 : vector<16x16xf32>
    %cst_33 = arith.constant dense<0xFF800000> : vector<16xf32>
    %86 = vector.multi_reduction <maximumf>, %85, %cst_33 [1] : vector<16x16xf32> to vector<16xf32>
    %87 = vector.shape_cast %86 : vector<16xf32> to vector<16x1xf32>
    %88 = vector.broadcast %87 : vector<16x1xf32> to vector<16x16xf32>
    %89 = arith.subf %85, %88 : vector<16x16xf32>
    %90 = math.exp %89 : vector<16x16xf32>
    %cst_34 = arith.constant dense<0.000000e+00> : vector<16xf32>
    %91 = vector.multi_reduction <add>, %90, %cst_34 [1] : vector<16x16xf32> to vector<16xf32>
    %92 = vector.shape_cast %91 : vector<16xf32> to vector<16x1xf32>
    %93 = arith.truncf %90 : vector<16x16xf32> to vector<16x16xbf16>
    %cst_35 = arith.constant dense<0.000000e+00> : vector<16x16xf32>
    %94 = tpu.matmul %93, %82, %cst_35 {dimension_numbers = #tpu.dot_dimension_numbers<[1], [0], [0], [1], [0, 0, 1, 1], [], []>} : vector<16x16xbf16>, vector<16x16xbf16>, vector<16x16xf32> -> vector<16x16xf32>
    %95 = tpu.reciprocal %92 {approx = true} : vector<16x1xf32> -> vector<16x1xf32>
    %96 = vector.broadcast %95 : vector<16x1xf32> to vector<16x16xf32>
    %97 = arith.mulf %94, %96 : vector<16x16xf32>
    %98 = arith.truncf %97 : vector<16x16xf32> to vector<16x16xbf16>
    %99 = vector.extract_strided_slice %40 {offsets = [32, 0], sizes = [16, 64], strides = [1, 1]} : vector<64x64xbf16> to vector<16x64xbf16>
    %cst_36 = arith.constant dense<0.000000e+00> : vector<16x64xf32>
    %100 = tpu.matmul %98, %99, %cst_36 {dimension_numbers = #tpu.dot_dimension_numbers<[1], [0], [0], [1], [0, 0, 1, 1], [], []>} : vector<16x16xbf16>, vector<16x64xbf16>, vector<16x64xf32> -> vector<16x64xf32>
    %101 = arith.addf %80, %100 : vector<16x64xf32>
    %102 = vector.extract_strided_slice %37 {offsets = [0, 48], sizes = [16, 16], strides = [1, 1]} : vector<16x128xbf16> to vector<16x16xbf16>
    %cst_37 = arith.constant dense<0.000000e+00> : vector<16x16xf32>
    %103 = tpu.matmul %102, %81, %cst_37 {dimension_numbers = #tpu.dot_dimension_numbers<[1], [1], [0], [0], [0, 0, 1, 0], [], []>} : vector<16x16xbf16>, vector<16x16xbf16>, vector<16x16xf32> -> vector<16x16xf32>
    %104 = arith.addf %103, %38 : vector<16x16xf32>
    %cst_38 = arith.constant dense<0xFF800000> : vector<16xf32>
    %105 = vector.multi_reduction <maximumf>, %104, %cst_38 [1] : vector<16x16xf32> to vector<16xf32>
    %106 = vector.shape_cast %105 : vector<16xf32> to vector<16x1xf32>
    %107 = vector.broadcast %106 : vector<16x1xf32> to vector<16x16xf32>
    %108 = arith.subf %104, %107 : vector<16x16xf32>
    %109 = math.exp %108 : vector<16x16xf32>
    %cst_39 = arith.constant dense<0.000000e+00> : vector<16xf32>
    %110 = vector.multi_reduction <add>, %109, %cst_39 [1] : vector<16x16xf32> to vector<16xf32>
    %111 = vector.shape_cast %110 : vector<16xf32> to vector<16x1xf32>
    %112 = arith.truncf %109 : vector<16x16xf32> to vector<16x16xbf16>
    %cst_40 = arith.constant dense<0.000000e+00> : vector<16x16xf32>
    %113 = tpu.matmul %112, %82, %cst_40 {dimension_numbers = #tpu.dot_dimension_numbers<[1], [0], [0], [1], [0, 0, 1, 1], [], []>} : vector<16x16xbf16>, vector<16x16xbf16>, vector<16x16xf32> -> vector<16x16xf32>
    %114 = tpu.reciprocal %111 {approx = true} : vector<16x1xf32> -> vector<16x1xf32>
    %115 = vector.broadcast %114 : vector<16x1xf32> to vector<16x16xf32>
    %116 = arith.mulf %113, %115 : vector<16x16xf32>
    %117 = arith.truncf %116 : vector<16x16xf32> to vector<16x16xbf16>
    %118 = vector.extract_strided_slice %40 {offsets = [48, 0], sizes = [16, 64], strides = [1, 1]} : vector<64x64xbf16> to vector<16x64xbf16>
    %cst_41 = arith.constant dense<0.000000e+00> : vector<16x64xf32>
    %119 = tpu.matmul %117, %118, %cst_41 {dimension_numbers = #tpu.dot_dimension_numbers<[1], [0], [0], [1], [0, 0, 1, 1], [], []>} : vector<16x16xbf16>, vector<16x64xbf16>, vector<16x64xf32> -> vector<16x64xf32>
    %120 = arith.addf %101, %119 : vector<16x64xf32>
    %c0_42 = arith.constant 0 : index
    %c0_43 = arith.constant 0 : index
    %c0_44 = arith.constant 0 : index
    %121 = vector.load %arg10[%c0_42, %c0_43, %c0_44] : memref<1x1x64xbf16, #tpu.memory_space<vmem>>, vector<1x1x64xbf16>
    %122 = vector.shape_cast %121 : vector<1x1x64xbf16> to vector<1x64xbf16>
    %123 = arith.mulf %120, %120 : vector<16x64xf32>
    %cst_45 = arith.constant dense<0.000000e+00> : vector<16xf32>
    %124 = vector.multi_reduction <add>, %123, %cst_45 [1] : vector<16x64xf32> to vector<16xf32>
    %125 = vector.shape_cast %124 : vector<16xf32> to vector<16x1xf32>
    %cst_46 = arith.constant 6.400000e+01 : f32
    %126 = vector.broadcast %cst_46 : f32 to vector<16x1xf32>
    %127 = arith.divf %125, %126 : vector<16x1xf32>
    %cst_47 = arith.constant 9.99999997E-7 : f32
    %128 = vector.broadcast %cst_47 : f32 to vector<16x1xf32>
    %129 = arith.addf %127, %128 : vector<16x1xf32>
    %130 = math.rsqrt %129 : vector<16x1xf32>
    %131 = vector.broadcast %130 : vector<16x1xf32> to vector<16x64xf32>
    %132 = arith.mulf %120, %131 : vector<16x64xf32>
    %133 = arith.extf %122 : vector<1x64xbf16> to vector<1x64xf32>
    %134 = vector.broadcast %133 : vector<1x64xf32> to vector<16x64xf32>
    %135 = arith.mulf %132, %134 : vector<16x64xf32>
    %136 = arith.truncf %135 : vector<16x64xf32> to vector<16x64xbf16>
    %c0_48 = arith.constant 0 : index
    %c0_49 = arith.constant 0 : index
    %c0_50 = arith.constant 0 : index
    %137 = vector.load %arg11[%c0_48, %c0_49, %c0_50] : memref<1x64x256xbf16, #tpu.memory_space<vmem>>, vector<1x64x256xbf16>
    %138 = vector.shape_cast %137 : vector<1x64x256xbf16> to vector<64x256xbf16>
    %cst_51 = arith.constant dense<0.000000e+00> : vector<16x256xf32>
    %139 = tpu.matmul %136, %138, %cst_51 {dimension_numbers = #tpu.dot_dimension_numbers<[1], [0], [0], [1], [0, 0, 1, 1], [], []>} : vector<16x64xbf16>, vector<64x256xbf16>, vector<16x256xf32> -> vector<16x256xf32>
    %140 = vector.extract_strided_slice %139 {offsets = [0, 0], sizes = [16, 128], strides = [1, 1]} : vector<16x256xf32> to vector<16x128xf32>
    %141 = vector.extract_strided_slice %139 {offsets = [0, 128], sizes = [16, 128], strides = [1, 1]} : vector<16x256xf32> to vector<16x128xf32>
    %142 = arith.negf %140 : vector<16x128xf32>
    %143 = math.exp %142 : vector<16x128xf32>
    %cst_52 = arith.constant 1.000000e+00 : f32
    %144 = vector.broadcast %cst_52 : f32 to vector<16x128xf32>
    %145 = arith.addf %144, %143 : vector<16x128xf32>
    %146 = arith.divf %144, %145 : vector<16x128xf32>
    %147 = arith.mulf %140, %146 : vector<16x128xf32>
    %148 = arith.mulf %147, %141 : vector<16x128xf32>
    %149 = arith.truncf %148 : vector<16x128xf32> to vector<16x128xbf16>
    %c0_53 = arith.constant 0 : index
    %c0_54 = arith.constant 0 : index
    %c0_55 = arith.constant 0 : index
    %150 = vector.load %arg12[%c0_53, %c0_54, %c0_55] : memref<1x128x64xbf16, #tpu.memory_space<vmem>>, vector<1x128x64xbf16>
    %151 = vector.shape_cast %150 : vector<1x128x64xbf16> to vector<128x64xbf16>
    %cst_56 = arith.constant dense<0.000000e+00> : vector<16x64xf32>
    %152 = tpu.matmul %149, %151, %cst_56 {dimension_numbers = #tpu.dot_dimension_numbers<[1], [0], [0], [1], [0, 0, 1, 1], [], []>} : vector<16x128xbf16>, vector<128x64xbf16>, vector<16x64xf32> -> vector<16x64xf32>
    %153 = arith.addf %120, %152 : vector<16x64xf32>
    %c0_57 = arith.constant 0 : index
    %c0_58 = arith.constant 0 : index
    %154 = vector.load %arg16[%c0_57, %c0_58] : memref<16x64xf32, #tpu.memory_space<vmem>>, vector<16x64xf32>
    tpu.vector_store %arg16[%c0_57, %c0_58], %153 {strides = array<i32>} : memref<16x64xf32, #tpu.memory_space<vmem>>, vector<16x64xf32>,
    %c1_i32 = arith.constant 1 : i32
    %155 = arith.cmpi eq, %arg0, %c1_i32 : i32
    %156 = arith.extui %155 : i1 to i32
    %c0_i32_59 = arith.constant 0 : i32
    %157 = arith.cmpi ne, %156, %c0_i32_59 : i32
    scf.if %157 {
      %c0_60 = arith.constant 0 : index
      %c0_61 = arith.constant 0 : index
      %158 = vector.load %arg16[%c0_60, %c0_61] : memref<16x64xf32, #tpu.memory_space<vmem>>, vector<16x64xf32>
      %c0_62 = arith.constant 0 : index
      %c0_63 = arith.constant 0 : index
      %159 = vector.load %arg13[%c0_62, %c0_63] : memref<1x64xbf16, #tpu.memory_space<vmem>>, vector<1x64xbf16>
      %160 = arith.mulf %158, %158 : vector<16x64xf32>
      %cst_64 = arith.constant dense<0.000000e+00> : vector<16xf32>
      %161 = vector.multi_reduction <add>, %160, %cst_64 [1] : vector<16x64xf32> to vector<16xf32>
      %162 = vector.shape_cast %161 : vector<16xf32> to vector<16x1xf32>
      %cst_65 = arith.constant 6.400000e+01 : f32
      %163 = vector.broadcast %cst_65 : f32 to vector<16x1xf32>
      %164 = arith.divf %162, %163 : vector<16x1xf32>
      %cst_66 = arith.constant 9.99999997E-7 : f32
      %165 = vector.broadcast %cst_66 : f32 to vector<16x1xf32>
      %166 = arith.addf %164, %165 : vector<16x1xf32>
      %167 = math.rsqrt %166 : vector<16x1xf32>
      %168 = vector.broadcast %167 : vector<16x1xf32> to vector<16x64xf32>
      %169 = arith.mulf %158, %168 : vector<16x64xf32>
      %170 = arith.extf %159 : vector<1x64xbf16> to vector<1x64xf32>
      %171 = vector.broadcast %170 : vector<1x64xf32> to vector<16x64xf32>
      %172 = arith.mulf %169, %171 : vector<16x64xf32>
      %173 = arith.truncf %172 : vector<16x64xf32> to vector<16x64xbf16>
      %c0_67 = arith.constant 0 : index
      %c0_68 = arith.constant 0 : index
      %174 = vector.load %arg14[%c0_67, %c0_68] : memref<64x256xbf16, #tpu.memory_space<vmem>>, vector<64x256xbf16>
      %cst_69 = arith.constant dense<0.000000e+00> : vector<16x256xf32>
      %175 = tpu.matmul %173, %174, %cst_69 {dimension_numbers = #tpu.dot_dimension_numbers<[1], [0], [0], [1], [0, 0, 1, 1], [], []>} : vector<16x64xbf16>, vector<64x256xbf16>, vector<16x256xf32> -> vector<16x256xf32>
      %c0_70 = arith.constant 0 : index
      %c0_71 = arith.constant 0 : index
      %176 = vector.load %arg15[%c0_70, %c0_71] : memref<16x256xf32, #tpu.memory_space<vmem>>, vector<16x256xf32>
      tpu.vector_store %arg15[%c0_70, %c0_71], %175 {strides = array<i32>} : memref<16x256xf32, #tpu.memory_space<vmem>>, vector<16x256xf32>,
    } else {
    }
    return
  }
  func.func @transform_0(%arg0: i32) -> (i32, i32) {
    %c0_i32 = arith.constant 0 : i32
    %c0_i32_0 = arith.constant 0 : i32
    %c0_i32_1 = arith.constant 0 : i32
    return %c0_i32, %c0_i32_0 : i32, i32
  }
  func.func @transform_1(%arg0: i32) -> (i32, i32) {
    %c0_i32 = arith.constant 0 : i32
    %c0_i32_0 = arith.constant 0 : i32
    %c0_i32_1 = arith.constant 0 : i32
    return %c0_i32, %c0_i32_0 : i32, i32
  }
  func.func @transform_2(%arg0: i32) -> (i32, i32) {
    %c0_i32 = arith.constant 0 : i32
    %c0_i32_0 = arith.constant 0 : i32
    %c0_i32_1 = arith.constant 0 : i32
    return %c0_i32, %c0_i32_0 : i32, i32
  }
  func.func @transform_3(%arg0: i32) -> (i32, i32) {
    %c0_i32 = arith.constant 0 : i32
    %c0_i32_0 = arith.constant 0 : i32
    %c0_i32_1 = arith.constant 0 : i32
    return %c0_i32, %c0_i32_0 : i32, i32
  }
  func.func @transform_4(%arg0: i32) -> (i32, i32) {
    %c0_i32 = arith.constant 0 : i32
    %c0_i32_0 = arith.constant 0 : i32
    %c0_i32_1 = arith.constant 0 : i32
    return %c0_i32, %c0_i32_0 : i32, i32
  }
  func.func @transform_5(%arg0: i32) -> (i32, i32) {
    %c0_i32 = arith.constant 0 : i32
    %c0_i32_0 = arith.constant 0 : i32
    %c0_i32_1 = arith.constant 0 : i32
    return %c0_i32, %c0_i32_0 : i32, i32
  }
  func.func @transform_6(%arg0: i32) -> (i32, i32, i32) {
    %c0_i32 = arith.constant 0 : i32
    %c0_i32_0 = arith.constant 0 : i32
    %c0_i32_1 = arith.constant 0 : i32
    return %arg0, %c0_i32, %c0_i32_0 : i32, i32, i32
  }
  func.func @transform_7(%arg0: i32) -> (i32, i32, i32) {
    %c0_i32 = arith.constant 0 : i32
    %c0_i32_0 = arith.constant 0 : i32
    %c0_i32_1 = arith.constant 0 : i32
    return %arg0, %c0_i32, %c0_i32_0 : i32, i32, i32
  }
  func.func @transform_8(%arg0: i32) -> (i32, i32, i32) {
    %c0_i32 = arith.constant 0 : i32
    %c0_i32_0 = arith.constant 0 : i32
    %c0_i32_1 = arith.constant 0 : i32
    return %arg0, %c0_i32, %c0_i32_0 : i32, i32, i32
  }
  func.func @transform_9(%arg0: i32) -> (i32, i32, i32) {
    %c0_i32 = arith.constant 0 : i32
    %c0_i32_0 = arith.constant 0 : i32
    %c0_i32_1 = arith.constant 0 : i32
    return %arg0, %c0_i32, %c0_i32_0 : i32, i32, i32
  }
  func.func @transform_10(%arg0: i32) -> (i32, i32, i32) {
    %c0_i32 = arith.constant 0 : i32
    %c0_i32_0 = arith.constant 0 : i32
    %c0_i32_1 = arith.constant 0 : i32
    return %arg0, %c0_i32, %c0_i32_0 : i32, i32, i32
  }
  func.func @transform_11(%arg0: i32) -> (i32, i32, i32) {
    %c0_i32 = arith.constant 0 : i32
    %c0_i32_0 = arith.constant 0 : i32
    %c0_i32_1 = arith.constant 0 : i32
    return %arg0, %c0_i32, %c0_i32_0 : i32, i32, i32
  }
  func.func @transform_12(%arg0: i32) -> (i32, i32) {
    %c0_i32 = arith.constant 0 : i32
    %c0_i32_0 = arith.constant 0 : i32
    %c0_i32_1 = arith.constant 0 : i32
    return %c0_i32, %c0_i32_0 : i32, i32
  }
  func.func @transform_13(%arg0: i32) -> (i32, i32) {
    %c0_i32 = arith.constant 0 : i32
    %c0_i32_0 = arith.constant 0 : i32
    %c0_i32_1 = arith.constant 0 : i32
    return %c0_i32, %c0_i32_0 : i32, i32
  }
  func.func @transform_14(%arg0: i32) -> (i32, i32) {
    %c0_i32 = arith.constant 0 : i32
    %c0_i32_0 = arith.constant 0 : i32
    %c0_i32_1 = arith.constant 0 : i32
    return %c0_i32, %c0_i32_0 : i32, i32
  }
}

</mosaic_0001>

<bundles_post_ra>
// kernel: tpu_custom_call.1
= control target key start
LH: loop header
LB: loop body
LE: loop exit
PB: predicated region body
PF: predicated region fallthrough
CT: control target
= control target key end

     0   :  { %s2753_s0 = inlined_call_operand.hbm [shape: bf16[16,64], index: 0, kind: input, shape index: {}]   ;;  %s2754_s1 = inlined_call_operand.vmem [shape: s32[16,1], index: 1, kind: input, shape index: {}]   ;;  %s2755_s2 = inlined_call_operand.vmem [shape: s32[1,16], index: 2, kind: input, shape index: {}]   ;;  %s2756_s3 = inlined_call_operand.vmem [shape: f32[16,128], index: 3, kind: input, shape index: {}]   ;;  %s2757_s4 = inlined_call_operand.hbm [shape: f32[16,128], index: 4, kind: input, shape index: {}]   ;;  %s2758_s5 = inlined_call_operand.hbm [shape: f32[16,128], index: 5, kind: input, shape index: {}]   ;;  %s2759_s6 = inlined_call_operand.vmem [shape: bf16[2,1,64], index: 6, kind: input, shape index: {}]   ;;  %s2760_s7 = inlined_call_operand.vmem [shape: bf16[2,64,128], index: 7, kind: input, shape index: {}]   ;;  %s2761_s8 = inlined_call_operand.hbm [shape: bf16[2,64,64], index: 8, kind: input, shape index: {}]   ;;  %s2762_s9 = inlined_call_operand.vmem [shape: bf16[2,1,64], index: 9, kind: input, shape index: {}]   ;;  %s2763_s10 = inlined_call_operand.vmem [shape: bf16[2,64,256], index: 10, kind: input, shape index: {}]   ;;  %s2764_s11 = inlined_call_operand.vmem [shape: bf16[2,128,64], index: 11, kind: input, shape index: {}]   ;;  %s2765_s12 = inlined_call_operand.vmem [shape: bf16[1,64], index: 12, kind: input, shape index: {}]   ;;  %s2766_s13 = inlined_call_operand.hbm [shape: bf16[64,256], index: 13, kind: input, shape index: {}]   ;;  %s2767_s14 = inlined_call_operand.hbm [shape: f32[16,256], index: 14, kind: output, shape index: {}]  }
   0x1   :  { %2770 = sst [smem:[#allocation19_spill]] %s2753_s0 }
   0x2   :  { %2771 = sst [smem:[#allocation20_spill]] %s2757_s4 }
   0x3   :  { %2772 = sst [smem:[#allocation21_spill]] %s2758_s5 }
   0x4   :  { %2773 = sst [smem:[#allocation22_spill]] %s2765_s12 }
   0x5   :  { %2774 = sst [smem:[#allocation23_spill]] %s2766_s13 }
   0x6   :  { %2775 = sst [smem:[#allocation24_spill]] %s2767_s14 }
   0x7   :  { %19 = vsyncpa [#allocation5], 0 }
   0x8   :  { %20 = vsyncpa [#allocation8], 0 }
   0x9   :  { %21 = vsyncpa [#allocation11], 0 }
   0xa   :  { %23 = vsyncpa [#allocation11 + $0x1], 0 }
   0xb   :  { %24 = vsyncpa [#allocation6], 0  ;;  %s2399_s29 = smov 0   ;;  %s2401_s30 = smov 0  }
   0xc   :  { %s2403_s15 = smov 0   ;;  %s2405_s16 = smov 0  }
   0xd LB: > { %s2418_s17 = sadd.s32 4294967295, %s2300_s16   ;;  %p228_p0 = scmp.ne.s32.totalorder %s2292_s30, %s2288_s29  ;;  %s2300_s16 = sphi %s2405_s16, %s2791_s16   ;;  %s2296_s15 = sphi %s2403_s15, %s2790_s15   ;;  %s2292_s30 = sphi %s2401_s30, %s2789_s30   ;;  %s2288_s29 = sphi %s2399_s29, %s2788_s29  }
   0xe   : > { %p229_p1 = scmp.eq.s32.totalorder %s2418_s17, 0  ;;  %p1698_p2 = scmp.ge.s32.totalorder %s2300_s16, 1 }
   0xf   : > { %p380_p3 = scmp.lt.s32.totalorder %s2300_s16, 3  ;;  %p1699_p4 = scmp.ne.s32.totalorder %s2418_s17, 0 }
  0x10   : > { %p2427_p5 = por %p229_p1, %p228_p0  ;;  %s2777_s4 = sld [smem:[#allocation20_spill]] }
  0x11   : > { %p2434_p6 = pnand %p1698_p2, %p380_p3  ;;  %s2302_s23 = smov [#allocation7]  }
  0x12   : > { %s416_s24 = sshll.u32 %s2302_s23, 4  ;;  %s2780_s13 = sld [smem:[#allocation23_spill]]  ;;  %s417_s24 = int_to_ptr.vmem [resolvable:$true] %s416_s24 }
  0x13   : > { %p1934_p7 = pneg %p2434_p6  ;;  %s2303_s29 = smov 128  }
  0x14   : > { %s2304_s19 = smov 8   ;;  %s2305_s20 = smov [#allocation12]  }
  0x15   : > { %p2442_p8 = pnand %p1934_p7, %p229_p1  ;;  %s447_s23 = sshll.u32 %s2305_s20, 4  ;;  %s448_s23 = int_to_ptr.vmem [resolvable:$true] %s447_s23 }
  0x16   : > { %s414_s21 = sshll.u32 %s2777_s4, 4  ;;  %s2781_s0 = sld [smem:[#allocation19_spill]]  ;;  %s415_s21 = int_to_ptr.hbm [resolvable:$true] %s414_s21 }
  0x17   : > { %1940 = dma.hbm_to_vmem [thread:$0]  (!%p2442_p8), %s415_s21, 256, %s417_s24, [#allocation8], %s2303_s29, %s2303_s29, %s2304_s19  }
  0x18   : > { %s445_s28 = sshll.u32 %s2780_s13, 4  ;;  %s2306_s26 = smov [#allocation4]   ;;  %s446_s28 = int_to_ptr.hbm [resolvable:$true] %s445_s28 }
  0x19   : > { %1946 = dma.hbm_to_vmem [thread:$0]  (!%p2442_p8), %s446_s28, 1024, %s448_s23, [#allocation11], %s2303_s29, %s2303_s29, %s2304_s19  }
  0x1a   : > { %s393_s27 = sshll.u32 %s2306_s26, 4  ;;  %s2782_s5 = sld [smem:[#allocation21_spill]]  ;;  %s394_s27 = int_to_ptr.vmem [resolvable:$true] %s393_s27 }
  0x1b   : > { %s2768_s14 = smov 64   ;;  %s2769_s20 = smov 4  }
  0x1c   : > { %s391_s12 = sshll.u32 %s2781_s0, 4  ;;  %s2309_s28 = smov [#allocation9]   ;;  %s392_s12 = int_to_ptr.hbm [resolvable:$true] %s391_s12 }
  0x1d   : > { %1937 = dma.hbm_to_vmem [thread:$0]  (!%p2442_p8), %s392_s12, 128, %s394_s27, [#allocation5], %s2768_s14, %s2768_s14, %s2769_s20  }
  0x1e   : > { %s430_s23 = sshll.u32 %s2309_s28, 4  ;;  %s2467_s26 = sadd.s32 1, %s2300_s16   ;;  %s431_s23 = int_to_ptr.vmem [resolvable:$true] %s430_s23 }
  0x1f   : > { %s215_s21 = sadd.s32 1, %s2296_s15  ;;  %s212_s24 = ssub.s32 %s2300_s16, %s2467_s26 }
  0x20   : > { %s428_s4 = sshll.u32 %s2782_s5, 4  ;;  %p222_p9 = scmp.ne.s32.totalorder %s2296_s15, %s2292_s30  ;;  %s429_s4 = int_to_ptr.hbm [resolvable:$true] %s428_s4 }
  0x21   : > { %1943 = dma.hbm_to_vmem [thread:$0]  (!%p2442_p8), %s429_s4, 256, %s431_s23, [#allocation8], %s2303_s29, %s2303_s29, %s2304_s19  }
  0x22   : > { %p213_p10 = scmp.eq.s32.totalorder %s212_s24, 0  ;;  %p223_p11 = scmp.eq.s32.totalorder %s2300_s16, 0 }
  0x23   : > { %p1955_p12 = scmp.lt.s32.totalorder %s2300_s16, 2  ;;  %s475_s0 = sand.u32 1, %s2300_s16  }
  0x24   : > { %s2478_s12 = scalar_select %p213_p10, %s2296_s15, %s215_s21  }
  0x25   : > { %p224_p13 = por %p223_p11, %p222_p9  ;;  %s477_s27 = sand.u32 1, %s2296_s15  }
  0x26   : > { %s1872_s14 = sshll.u32 %s2300_s16, 5  ;;  %s1704_s28 = sshll.u32 %s477_s27, 5 }
  0x27   : > { %s484_s29 = scalar_lea.hbm %s2761_s8, %s1872_s14  ;;  %s479_s4 = scalar_lea.vmem [#allocation10], %s1704_s28 }
  0x28   : > { %s485_s19 = sshll.u32 %s484_s29, 4  ;;  %s487_s23 = sshll.u32 %s479_s4, 4  ;;  %s486_s19 = int_to_ptr.hbm [resolvable:$true] %s485_s19  ;;  %s488_s23 = int_to_ptr.vmem [resolvable:$true] %s487_s23 }
  0x29   : > { %p2487_p0 = pnand %p1955_p12, %p224_p13  ;;  %s476_s21 = scalar_lea.sflag [#allocation11], %s475_s0 }
  0x2a   : > { %s2192_s5 = sshra.s32 %s486_s19, 4  ;;  %s2199_s27 = scalar_lea.hbm %s2761_s8, 64  ;;  %s2193_s5 = int_to_ptr.hbm [resolvable:$true] %s2192_s5 }
  0x2b   : > { %s2194_s13 = scalar_lea.hbm %s2193_s5, 32  ;;  %p2196_p3 = pneg %p2487_p0 }
  0x2c   : > { %p2195_p2 = scmp.ne.s32.totalorder %s2193_s5, %s2194_s13  ;;  %p2200_p9 = scmp.lt.s32.totalorder %s2193_s5, %s2761_s8 }
  0x2d   : > { %p2201_p10 = scmp.lt.s32.totalorder %s2199_s27, %s2194_s13 }
  0x2e   : > { %p2197_p7 = pnand %p2196_p3, %p2195_p2 }
  0x2f   : > { %p2202_p11 = por %p2201_p10, %p2200_p9 }
  0x30   : > { %p2198_p8 = pneg %p2197_p7 }
  0x32   : > { %p2203_p12 = pnand %p2202_p11, %p2198_p8 }
  0x34   : > { %2206 = shalt.err (!%p2203_p12)
}
  0x35   : > { %s2784_s0 = smov 4   ;;  %s2785_s25 = smov 64  }
  0x36   : > { %1950 = dma.hbm_to_vmem [thread:$0]  (!%p2487_p0), %s486_s19, 512, %s488_s23, %s476_s21, %s2785_s25, %s2785_s25, %s2784_s0  }
  0x37   : > { %521 = sbr.rel (%p2434_p6) target bundleno = 2767 (0xacf), region = 76 }
  0x3c   : > { %2267 = dma.done.wait (%p229_p1), [#allocation5], 128  }
  0x3d   : > { %2269 = vsyncadd (%p229_p1), [#allocation5], 4294967168 }
  0x3e   : > { %2271 = dma.done.wait (%p229_p1), [#allocation8], 512  }
  0x3f   : > { %2273 = vsyncadd (%p229_p1), [#allocation8], 4294966784  ;;  %s538_s5 = sand.u32 1, %s2418_s17   ;;  %s540_s13 = sand.u32 1, %s2292_s30  }
  0x40   : > { %s1711_s29 = sshll.u32 %s540_s13, 5  ;;  %s539_s22 = scalar_lea.sflag [#allocation11], %s538_s5 }
  0x41   : > { %s2516_s19 = scalar_lea.vmem [#allocation10], %s1711_s29 }
  0x42   : > { %2275 = dma.done.wait (%p2427_p5), %s539_s22, 512  }
  0x43   : > { %2277 = vsyncadd (%p2427_p5), %s539_s22, 4294966784 }
  0x44   : > { %2279 = dma.done.wait (%p229_p1), [#allocation11], 1024  }
  0x45   : > { %2281 = vsyncadd (%p229_p1), [#allocation11], 4294966272  ;;  %p609_p6 = scmp.lt.s32.totalorder %s2418_s17, 1 }
  0x47   : > { %s2528_s4 = scalar_select %p609_p6, %s2418_s17, 1 }
  0x48   : > { %634 = sbr.rel (%p1699_p4) target bundleno = 206 (0xce), region = 100 }
  0x49   : > { %s611_s18 = scalar_lea.vmem %s2759_s6, %s2528_s4  ;;  %s1873_s21 = sshll.u32 %s2528_s4, 5 }
  0x4a   : > { %s2538_s27 = scalar_lea.vmem %s2760_s7, %s1873_s21  ;;  %s619_s0 = scalar_lea.vmem %s2762_s9, %s2528_s4 }
  0x4b   : > { %s1874_s25 = sshll.u32 %s2528_s4, 6 }
  0x4c   : > { %s2548_s29 = scalar_lea.vmem %s2763_s10, %s1874_s25  ;;  %s2553_s24 = scalar_lea.vmem %s2764_s11, %s1874_s25 }
  0x4d   : > { %v647_v0 = vld [vmem:[%s2754_s1] sm:$0xff]  ;;  %v2310_v1 = vmov 0   ;;  %v648_v2 = vld [vmem:[%s2754_s1 + $0x8] sm:$0xff]  ;;  %vm639_vm0 = vcmask 523264   ;;  %v642_v6 = vlaneseq  ;;  %vm665_vm2 = vcmask 130048  }
  0x4e   : > { %2016 = vset.pattern.permute.xlu0 %v2310_v1  ;;  %v1909_v3 = vld [vmem:[#allocation4] sm:$0xff]   ;;  %v2311_v11 = vmov -1e+30  }
  0x4f   : > { %651 = vperm.xlu0 %2016, %v647_v0   ;;  %v1910_v4 = vunpack.c.l.bf16 %v1909_v3  ;;  %v1911_v5 = vunpack.c.h.bf16 %v1909_v3  ;;  %v643_v7 = vshrl.u32 %v642_v6, 7  ;;  %v646_v8 = vand.u32 127, %v642_v6  ;;  %v2017_v9 = vld [vmem:[%s2755_s2] ss:$0 sm:$0xff] }
  0x51   : > { %640 = vst.msk [vmem:[#allocation2] sm:$0xff] %vm639_vm0, %v1910_v4  ;;  %vm659_vm1 = vcmp.le.s32.totalorder %v646_v8, %v643_v7  ;;  %v644_v13 = vadd.s32 8, %v643_v7 }
  0x52   : > { %641 = vst.msk [vmem:[#allocation2 + $0x8] sm:$0xff] %vm639_vm0, %v1911_v5 }
  0x53   : > { %vm660_vm5 = vcmp.le.s32.totalorder %v646_v8, %v644_v13 }
  0x57   : > { %654 = vperm.xlu0 %2016, %v648_v2  }
  0xc1   : > { %v652_v10 = vpop.permute.xlu0 %651 }
  0xc2   : > { %vm657_vm3 = vcmp.eq.s32.totalorder %v652_v10, %v2017_v9 }
  0xc3   : > { %vm661_vm4 = vmand %vm657_vm3, %vm659_vm1 }
  0xc4   : > { %v663_v12 = vsel %vm661_vm4, 0.0, %v2311_v11 }
  0xc5   : > { %666 = vst.msk [vmem:[#allocation3] sm:$0xff] %vm665_vm2, %v663_v12 }
  0xc9   : > { %v655_v14 = vpop.permute.xlu0 %654 }
  0xca   : > { %vm658_vm6 = vcmp.eq.s32.totalorder %v655_v14, %v2017_v9 }
  0xcb   : > { %vm662_vm7 = vmand %vm658_vm6, %vm660_vm5 }
  0xcc   : > { %v664_v15 = vsel %vm662_vm7, 0.0, %v2311_v11 }
  0xcd   : > { %667 = vst.msk [vmem:[#allocation3 + $0x8] sm:$0xff] %vm665_vm2, %v664_v15 }
  0xce PF: > { %v2566_v16 = vld [vmem:[#allocation2] sm:$0xff]  ;;  %vm673_vm8 = vcmask 523264   ;;  %v2570_v18 = vld [vmem:[#allocation2 + $0x8] sm:$0xff]  ;;  %v2312_v22 = vmov 64.0   ;;  %v1879_v26 = vld [vmem:[%s2538_s27 + $0x18] sm:$0xff]  ;;  %s2314_s13 = smov 120  }
  0xcf   : > { %v671_v17 = vmul.f32 %v2566_v16, %v2566_v16  ;;  %v672_v20 = vmul.f32 %v2570_v18, %v2570_v18  ;;  %2018 = vrcp.f32 %v2312_v22  ;;  %757 = vmatpush.bf16.msra.mxu0 %v1879_v26  ;;  %v1878_v28 = vld [vmem:[%s2538_s27 + $0x10] sm:$0xff]  ;;  %v1877_v30 = vld [vmem:[%s2538_s27 + $0x8] sm:$0xff]  ;;  %v1876_v32 = vld [vmem:[%s2538_s27] sm:$0xff]  ;;  %s2315_s20 = smov 64   ;;  %s2316_s28 = smov 32   ;;  %vm816_vm0 = vcmask 130048  }
  0xd0   : > { %v670_v48 = vld [vmem:[%s611_s18] sm:$0x1]  ;;  %s2313_s18 = smov 8   ;;  %v785_v0 = vld [vmem:[#allocation7] sm:$0xff]  ;;  %v791_v5 = vld [vmem:[#allocation9] sm:$0xff]  ;;  %s2317_s16 = smov 112  }
  0xd1   : > { %v674_v19 = vsel %vm673_vm8, %v671_v17, 0.0  ;;  %v677_v21 = vsel %vm673_vm8, %v672_v20, 0.0  ;;  %v713_v50 = vunpack.c.l.bf16 %v670_v48  ;;  %v781_v1 = vld [vmem:[%s2756_s3] sm:$0xff]  ;;  %v782_v7 = vld [vmem:[%s2756_s3 + $0x8] sm:$0xff]  ;;  %v786_v8 = vld [vmem:[#allocation7 + $0x8] sm:$0xff]  ;;  %s2318_s25 = smov 80  }
  0xd2   : > { %675 = vadd.xlane.f32.xlu0 %v674_v19  ;;  %v792_v10 = vld [vmem:[#allocation9 + $0x8] sm:$0xff]  ;;  %v1880_v26 = vld [vmem:[%s2516_s19] sm:$0xff]  ;;  %s2319_s27 = smov 48   ;;  %s2320_s5 = smov 96  }
  0xd3   : > { %758 = vmatpush.bf16.msra.mxu0 %v1878_v28  ;;  %v714_v55 = vperm.slane %v713_v50, 0  ;;  %897 = vmatpush.bf16.msra.mxu3 %v1880_v26  ;;  %p1833_p1 = scmp.ne.s32.totalorder %s2418_s17, 1 }
  0xd5   : > { %v2019_v23 = vpop.eup %2018 }
  0xd6   : > { %v681_v24 = vmul.f32 64.0, %v2019_v23  ;;  %vm685_vm9 = vweird.f32 %v2019_v23 }
  0xd7   : > { %759 = vmatpush.bf16.msra.mxu0 %v1877_v30  ;;  %v2607_v30 = vld [vmem:[#allocation3] sm:$0xff] }
  0xd8   : > { %v682_v25 = vsub.f32 1.0, %v681_v24 }
  0xda   : > { %678 = vadd.xlane.f32.xlu0 %v677_v21  ;;  %v683_v27 = vmul.f32 %v2019_v23, %v682_v25 }
  0xdb   : > { %760 = vmatpush.bf16.msra.mxu0 %v1876_v32 }
  0xdc   : > { %v684_v29 = vadd.f32 %v2019_v23, %v683_v27 }
  0xde   : > { %v2579_v31 = vsel %vm685_vm9, %v2019_v23, %v684_v29 }
 0x145   : > { %v676_v33 = vpop.xlane.xlu0 %675 }
 0x146   : > { %v687_v34 = vmul.f32 %v2579_v31, %v676_v33 }
 0x148   : > { %v689_v35 = vadd.f32 1e-06, %v687_v34 }
 0x14a   : > { %2020 = vrsqrt.f32 %v689_v35  ;;  %vm697_vm11 = vweird.f32 %v689_v35 }
 0x14d   : > { %v679_v36 = vpop.xlane.xlu0 %678 }
 0x14e   : > { %v688_v37 = vmul.f32 %v2579_v31, %v679_v36 }
 0x150   : > { %v2021_v38 = vpop.eup %2020  ;;  %v690_v39 = vadd.f32 1e-06, %v688_v37 }
 0x151   : > { %v692_v40 = vmul.f32 %v2021_v38, %v689_v35  ;;  %vm698_vm10 = vweird.f32 %v2021_v38  ;;  %v2611_v35 = vld [vmem:[#allocation3 + $0x8] sm:$0xff] }
 0x152   : > { %2022 = vrsqrt.f32 %v690_v39  ;;  %vm699_vm12 = vmor %vm697_vm11, %vm698_vm10  ;;  %vm707_vm14 = vweird.f32 %v690_v39 }
 0x153   : > { %v693_v41 = vmul.f32 %v2021_v38, %v692_v40 }
 0x155   : > { %v694_v42 = vmul.f32 0.5, %v693_v41 }
 0x157   : > { %v695_v43 = vsub.f32 1.5, %v694_v42 }
 0x158   : > { %v2023_v44 = vpop.eup %2022 }
 0x159   : > { %v702_v45 = vmul.f32 %v2023_v44, %v690_v39  ;;  %v696_v46 = vmul.f32 %v2021_v38, %v695_v43  ;;  %vm708_vm13 = vweird.f32 %v2023_v44 }
 0x15a   : > { %vm709_vm15 = vmor %vm707_vm14, %vm708_vm13 }
 0x15b   : > { %v703_v47 = vmul.f32 %v2023_v44, %v702_v45  ;;  %v700_v51 = vsel %vm699_vm12, %v2021_v38, %v696_v46 }
 0x15c   : > { %v711_v54 = vmul.f32 %v700_v51, %v2566_v16 }
 0x15d   : > { %v704_v49 = vmul.f32 0.5, %v703_v47 }
 0x15e   : > { %v715_v58 = vmul.f32 %v714_v55, %v711_v54 }
 0x15f   : > { %v705_v52 = vsub.f32 1.5, %v704_v49 }
 0x161   : > { %v706_v53 = vmul.f32 %v2023_v44, %v705_v52 }
 0x163   : > { %v710_v56 = vsel %vm709_vm15, %v2023_v44, %v706_v53 }
 0x164   : > { %v712_v57 = vmul.f32 %v710_v56, %v2570_v18 }
 0x166   : > { %v716_v59 = vmul.f32 %v714_v55, %v712_v57 }
 0x168   : > { %v717_v60 = vpack.c.bf16 %v716_v59, %v715_v58 }
 0x16a   : > { %1736 = vmatmul.msk.bf16.vlgmr.msra.gmra.mxu0 %vm673_vm8, %v717_v60 }
 0x1e7   : > { %v762_v61 = vpop.f32.mrf.mxu0 }
 0x1e8   : > { %775 = vrot.lane.b32.xlu2 %v762_v61, %s2313_s18  ;;  %769 = vrot.lane.b32.xlu1 %v762_v61, %s2314_s13  ;;  %v783_v4 = vmul.f32 %v781_v1, %v762_v61 }
 0x1ef   : > { %v764_v62 = vpop.f32.mrf.mxu0 }
 0x1f0   : > { %777 = vrot.lane.b32.xlu2 %v764_v62, %s2313_s18  ;;  %771 = vrot.lane.b32.xlu1 %v764_v62, %s2314_s13  ;;  %v784_v13 = vmul.f32 %v782_v7, %v764_v62  ;;  %s2321_s18 = smov 16  }
 0x242   : > { %v776_v63 = vpop.permute.xlu2 %775 }
 0x243   : > { %v793_v9 = vmul.f32 %v791_v5, %v776_v63 }
 0x24a   : > { %v778_v11 = vpop.permute.xlu2 %777 }
 0x24b   : > { %v794_v17 = vmul.f32 %v792_v10, %v778_v11 }
 0x25a   : > { %v770_v2 = vpop.permute.xlu1 %769 }
 0x25b   : > { %v787_v3 = vmul.f32 %v785_v0, %v770_v2 }
 0x25d   : > { %v789_v6 = vadd.f32 %v787_v3, %v783_v4 }
 0x25f   : > { %v795_v14 = vadd.f32 %v793_v9, %v789_v6 }
 0x261   : > { %v797_v20 = vpack.c.bf16 %v795_v14, %v795_v14 }
 0x262   : > { %v772_v12 = vpop.permute.xlu1 %771 }
 0x263   : > { %v788_v15 = vmul.f32 %v786_v8, %v772_v12  ;;  %v811_v23 = vunpack.c.l.b16 %v797_v20 }
 0x265   : > { %v790_v19 = vadd.f32 %v788_v15, %v784_v13  ;;  %v1881_v13 = vld [vmem:[%s2516_s19 + $0x8] sm:$0xff] }
 0x267   : > { %v796_v21 = vadd.f32 %v794_v17, %v790_v19 }
 0x269   : > { %v798_v22 = vpack.c.bf16 %v796_v21, %v796_v21 }
 0x26b   : > { %v812_v24 = vunpack.c.l.b16 %v798_v22 }
 0x26d   : > { %v2598_v25 = vpack.c.b16 %v812_v24, %v811_v23 }
 0x26f   : > { %814 = vrot.lane.b32.xlu0 %v2598_v25, %s2315_s20 }
 0x277   : > { %856 = vrot.lane.b32.xlu0 %v2598_v25, %s2316_s28 }
 0x27f   : > { %906 = vrot.lane.b32.xlu0 %v2598_v25, %s2317_s16 }
 0x2e1   : > { %v815_v27 = vpop.permute.xlu0 %814 }
 0x2e2   : > { %v821_v28 = vsel %vm816_vm0, %v815_v27, 0 }
 0x2e3   : > { %830 = vmatpush.bf16.xpose.msra.mxu1 %v821_v28 }
 0x2e9   : > { %v857_v29 = vpop.permute.xlu0 %856 }
 0x2ea   : > { %1737 = vmatmul.msk.bf16.vlgmr.msra.gmra.mxu1 %vm816_vm0, %v2598_v25  ;;  %869 = vmatpush.bf16.msra.mxu2 %v857_v29 }
 0x2eb   : > { %954 = vmatpush.bf16.msrb.mxu3 %v857_v29  ;;  %982 = vmatpush.bf16.msrb.mxu1 %v1881_v13 }
 0x2ee   : > { %918 = vmatpush.bf16.xpose.msrb.mxu2 %v821_v28 }
 0x2f1   : > { %v907_v50 = vpop.permute.xlu0 %906 }
 0x367   : > { %v832_v32 = vpop.f32.mrf.mxu1 }
 0x368   : > { %v833_v33 = vadd.f32 %v832_v32, %v2607_v30 }
 0x36a   : > { %v837_v34 = vsel %vm816_vm0, %v833_v33, -inf }
 0x36b   : > { %838 = vmax.xlane.f32.xlu1 %v837_v34 }
 0x36f   : > { %v834_v36 = vpop.f32.mrf.mxu1 }
 0x370   : > { %v835_v37 = vadd.f32 %v834_v36, %v2611_v35 }
 0x372   : > { %v840_v38 = vsel %vm816_vm0, %v835_v37, -inf }
 0x373   : > { %841 = vmax.xlane.f32.xlu2 %v840_v38 }
 0x3de   : > { %v839_v39 = vpop.xlane.xlu1 %838 }
 0x3df   : > { %v843_v40 = vsub.f32 %v833_v33, %v839_v39 }
 0x3e1   : > { %v845_v41 = vmul.f32 1.442695, %v843_v40 }
 0x3e3   : > { %2024 = vpow2.f32 %v845_v41 }
 0x3e6   : > { %v842_v42 = vpop.xlane.xlu2 %841 }
 0x3e7   : > { %v844_v43 = vsub.f32 %v835_v37, %v842_v42 }
 0x3e9   : > { %v2025_v44 = vpop.eup %2024  ;;  %v847_v45 = vmul.f32 1.442695, %v844_v43 }
 0x3ea   : > { %v849_v46 = vsel %vm816_vm0, %v2025_v44, 0.0 }
 0x3eb   : > { %2026 = vpow2.f32 %v847_v45  ;;  %850 = vadd.xlane.f32.xlu0 %v849_v46 }
 0x3f1   : > { %v2027_v47 = vpop.eup %2026 }
 0x3f2   : > { %v852_v48 = vsel %vm816_vm0, %v2027_v47, 0.0  ;;  %v855_v49 = vpack.c.bf16 %v2027_v47, %v2025_v44 }
 0x3f3   : > { %853 = vadd.xlane.f32.xlu2 %v852_v48 }
 0x3f4   : > { %1738 = vmatmul.msk.bf16.vlgmr.msra.gmra.mxu2 %vm816_vm0, %v855_v49 }
 0x3ff   : > { %1084 = vrot.lane.b32.xlu0 %v2598_v25, %s2318_s25 }
 0x404   : > { %1744 = vmatmul.msk.bf16.vlgmr.msrb.gmra.mxu2 %vm816_vm0, %v907_v50 }
 0x45e   : > { %v851_v51 = vpop.xlane.xlu0 %850 }
 0x45f   : > { %2028 = vrcp.f32 %v851_v51 }
 0x465   : > { %v2029_v54 = vpop.eup %2028 }
 0x466   : > { %v854_v52 = vpop.xlane.xlu2 %853 }
 0x467   : > { %2030 = vrcp.f32 %v854_v52 }
 0x46d   : > { %v2031_v55 = vpop.eup %2030 }
 0x471   : > { %v1085_v33 = vpop.permute.xlu0 %1084 }
 0x477   : > { %v871_v53 = vpop.f32.mrf.mxu2 }
 0x478   : > { %v878_v57 = vmul.f32 %v2029_v54, %v871_v53 }
 0x47f   : > { %v873_v56 = vpop.f32.mrf.mxu2 }
 0x480   : > { %v879_v58 = vmul.f32 %v2031_v55, %v873_v56 }
 0x482   : > { %v880_v59 = vpack.c.bf16 %v879_v58, %v878_v57 }
 0x484   : > { %1743 = vmatmul.msk.bf16.vlgmr.msra.gmra.mxu3 %vm816_vm0, %v880_v59 }
 0x487   : > { %v920_v60 = vpop.f32.mrf.mxu2 }
 0x488   : > { %v921_v61 = vadd.f32 %v920_v60, %v2607_v30 }
 0x48a   : > { %v925_v62 = vsel %vm816_vm0, %v921_v61, -inf }
 0x48b   : > { %926 = vmax.xlane.f32.xlu1 %v925_v62 }
 0x48f   : > { %v922_v63 = vpop.f32.mrf.mxu2 }
 0x490   : > { %v923_v0 = vadd.f32 %v922_v63, %v2611_v35 }
 0x492   : > { %v928_v1 = vsel %vm816_vm0, %v923_v0, -inf }
 0x493   : > { %929 = vmax.xlane.f32.xlu2 %v928_v1 }
 0x4fe   : > { %v927_v2 = vpop.xlane.xlu1 %926 }
 0x4ff   : > { %v931_v3 = vsub.f32 %v921_v61, %v927_v2 }
 0x501   : > { %v933_v4 = vmul.f32 1.442695, %v931_v3 }
 0x503   : > { %2032 = vpow2.f32 %v933_v4 }
 0x506   : > { %v930_v5 = vpop.xlane.xlu2 %929 }
 0x507   : > { %v932_v6 = vsub.f32 %v923_v0, %v930_v5  ;;  %v899_v14 = vpop.f32.mrf.mxu3 }
 0x508   : > { %v904_v34 = vadd.f32 %v899_v14, %v2566_v16 }
 0x509   : > { %v2033_v7 = vpop.eup %2032  ;;  %v935_v8 = vmul.f32 1.442695, %v932_v6  ;;  %v1882_v6 = vld [vmem:[%s2516_s19 + $0x10] sm:$0xff] }
 0x50a   : > { %v937_v9 = vsel %vm816_vm0, %v2033_v7, 0.0  ;;  %1075 = vmatpush.bf16.msra.mxu3 %v1882_v6 }
 0x50b   : > { %2034 = vpow2.f32 %v935_v8  ;;  %938 = vadd.xlane.f32.xlu1 %v937_v9 }
 0x50f   : > { %v2631_v17 = vpop.f32.mrf.mxu3 }
 0x511   : > { %v2035_v10 = vpop.eup %2034 }
 0x512   : > { %v940_v11 = vsel %vm816_vm0, %v2035_v10, 0.0  ;;  %v943_v12 = vpack.c.bf16 %v2035_v10, %v2033_v7  ;;  %v1883_v7 = vld [vmem:[%s2516_s19 + $0x18] sm:$0xff] }
 0x513   : > { %941 = vadd.xlane.f32.xlu2 %v940_v11 }
 0x514   : > { %1745 = vmatmul.msk.bf16.vlgmr.msrb.gmra.mxu3 %vm816_vm0, %v943_v12 }
 0x524   : > { %993 = vrot.lane.b32.xlu1 %v2598_v25, %s2319_s27 }
 0x52b   : > { %991 = vrot.lane.b32.xlu2 %v2598_v25, %s2320_s5 }
 0x57e   : > { %v939_v15 = vpop.xlane.xlu1 %938 }
 0x57f   : > { %2036 = vrcp.f32 %v939_v15 }
 0x585   : > { %v2037_v23 = vpop.eup %2036 }
 0x586   : > { %v942_v19 = vpop.xlane.xlu2 %941 }
 0x587   : > { %2038 = vrcp.f32 %v942_v19 }
 0x58d   : > { %v2039_v26 = vpop.eup %2038 }
 0x58e   : > { %v992_v24 = vpop.permute.xlu2 %991 }
 0x596   : > { %v994_v20 = vpop.permute.xlu1 %993 }
 0x597   : > { %v999_v21 = vsel %vm816_vm0, %v994_v20, 0  ;;  %v956_v22 = vpop.f32.mrf.mxu3 }
 0x598   : > { %1008 = vmatpush.bf16.xpose.msra.mxu2 %v999_v21  ;;  %1096 = vmatpush.bf16.xpose.msra.mxu1 %v999_v21  ;;  %v963_v28 = vmul.f32 %v2037_v23, %v956_v22 }
 0x59f   : > { %v958_v27 = vpop.f32.mrf.mxu3  ;;  %1751 = vmatmul.msk.bf16.vlgmr.msra.gmra.mxu2 %vm816_vm0, %v992_v24 }
 0x5a0   : > { %v964_v29 = vmul.f32 %v2039_v26, %v958_v27 }
 0x5a2   : > { %v965_v32 = vpack.c.bf16 %v964_v29, %v963_v28 }
 0x5a4   : > { %1750 = vmatmul.msk.bf16.vlgmr.msrb.gmra.mxu1 %vm816_vm0, %v965_v32 }
 0x5b4   : > { %1758 = vmatmul.msk.bf16.vlgmr.msra.gmra.mxu1 %vm816_vm0, %v1085_v33 }
 0x621   : > { %v984_v36 = vpop.f32.mrf.mxu1 }
 0x622   : > { %v2638_v37 = vadd.f32 %v984_v36, %v904_v34  ;;  %v1010_v38 = vpop.f32.mrf.mxu2 }
 0x623   : > { %v1011_v39 = vadd.f32 %v1010_v38, %v2607_v30  ;;  %v905_v38 = vadd.f32 %v2631_v17, %v2570_v18 }
 0x625   : > { %v1015_v40 = vsel %vm816_vm0, %v1011_v39, -inf }
 0x626   : > { %1016 = vmax.xlane.f32.xlu1 %v1015_v40 }
 0x629   : > { %v2642_v41 = vpop.f32.mrf.mxu1 }
 0x62a   : > { %v1012_v42 = vpop.f32.mrf.mxu2 }
 0x62b   : > { %v1013_v43 = vadd.f32 %v1012_v42, %v2611_v35  ;;  %v990_v42 = vadd.f32 %v2642_v41, %v905_v38  ;;  %v1891_v41 = vld [vmem:[%s2548_s29 + $0x34] sm:$0xf0] }
 0x62c   : > { %v1899_v38 = vld [vmem:[%s2553_s24 + $0x38] sm:$0xff] }
 0x62d   : > { %v1018_v44 = vsel %vm816_vm0, %v1013_v43, -inf }
 0x62e   : > { %1019 = vmax.xlane.f32.xlu2 %v1018_v44 }
 0x631   : > { %v1098_v45 = vpop.f32.mrf.mxu1 }
 0x632   : > { %v1099_v16 = vadd.f32 %v1098_v45, %v2607_v30 }
 0x634   : > { %v1103_v46 = vsel %vm816_vm0, %v1099_v16, -inf }
 0x635   : > { %1104 = vmax.xlane.f32.xlu0 %v1103_v46  ;;  %v1890_v46 = vld [vmem:[%s2548_s29 + $0x34] sm:$0xf] }
 0x639   : > { %v1100_v47 = vpop.f32.mrf.mxu1 }
 0x63a   : > { %v1101_v48 = vadd.f32 %v1100_v47, %v2611_v35 }
 0x63c   : > { %v1106_v49 = vsel %vm816_vm0, %v1101_v48, -inf }
 0x63d   : > { %1107 = vmax.xlane.f32.xlu1 %v1106_v49 }
 0x646   : > { %1034 = vrot.lane.b32.xlu2 %v2598_v25, %s2321_s18 }
 0x699   : > { %v1017_v50 = vpop.xlane.xlu1 %1016 }
 0x69a   : > { %v1021_v51 = vsub.f32 %v1011_v39, %v1017_v50  ;;  %v1783_v50 = vld [vmem:[%s2548_s29 + $0x20] sm:$0xf] }
 0x69c   : > { %v1023_v52 = vmul.f32 1.442695, %v1021_v51  ;;  %v1889_v51 = vld [vmem:[%s2548_s29 + $0x24] sm:$0xf0] }
 0x69e   : > { %2040 = vpow2.f32 %v1023_v52  ;;  %v1888_v52 = vld [vmem:[%s2548_s29 + $0x24] sm:$0xf] }
 0x6a1   : > { %v1020_v53 = vpop.xlane.xlu2 %1019 }
 0x6a2   : > { %v1022_v54 = vsub.f32 %v1013_v43, %v1020_v53  ;;  %v1784_v53 = vor.u32 %v1889_v51, %v1783_v50 }
 0x6a4   : > { %v2041_v30 = vpop.eup %2040  ;;  %v1025_v55 = vmul.f32 1.442695, %v1022_v54  ;;  %v1785_v54 = vld [vmem:[%s2548_s29 + $0x28] sm:$0xf0] }
 0x6a5   : > { %v1027_v56 = vsel %vm816_vm0, %v2041_v30, 0.0 }
 0x6a6   : > { %2042 = vpow2.f32 %v1025_v55  ;;  %1028 = vadd.xlane.f32.xlu1 %v1027_v56  ;;  %v1775_v55 = vld [vmem:[%s2548_s29 + $0x10] sm:$0xf]  ;;  %v1887_v56 = vld [vmem:[%s2548_s29 + $0x14] sm:$0xf0] }
 0x6a8   : > { %v1105_v35 = vpop.xlane.xlu0 %1104 }
 0x6a9   : > { %v1109_v57 = vsub.f32 %v1099_v16, %v1105_v35  ;;  %v1035_v58 = vpop.permute.xlu2 %1034  ;;  %v1791_v16 = vld [vmem:[%s2548_s29 + $0x30] sm:$0xf]  ;;  %v1886_v35 = vld [vmem:[%s2548_s29 + $0x14] sm:$0xf] }
 0x6aa   : > { %1047 = vmatpush.bf16.msrb.mxu2 %v1035_v58  ;;  %1132 = vmatpush.bf16.msrb.mxu0 %v1035_v58  ;;  %v1792_v47 = vor.u32 %v1891_v41, %v1791_v16  ;;  %v1777_v58 = vld [vmem:[%s2548_s29 + $0x18] sm:$0xf0]  ;;  %v1892_v16 = vld [vmem:[%s2553_s24] sm:$0xff] }
 0x6ab   : > { %v1111_v59 = vmul.f32 1.442695, %v1109_v57  ;;  %v1776_v57 = vor.u32 %v1887_v56, %v1775_v55 }
 0x6ac   : > { %v2043_v60 = vpop.eup %2042  ;;  %1264 = vmatpush.bf16.msrb.mxu3 %v1792_v47 }
 0x6ad   : > { %v1033_v25 = vpack.c.bf16 %v2043_v60, %v2041_v30  ;;  %2044 = vpow2.f32 %v1111_v59  ;;  %v1030_v61 = vsel %vm816_vm0, %v2043_v60, 0.0  ;;  %v1788_v30 = vor.u32 %v1888_v52, %v1785_v54 }
 0x6ae   : > { %1031 = vadd.xlane.f32.xlu0 %v1030_v61  ;;  %1160 = vmatpush.bf16.msra.mxu2 %v1883_v7  ;;  %v1780_v59 = vor.u32 %v1886_v35, %v1777_v58  ;;  %v1885_v61 = vld [vmem:[%s2548_s29 + $0x4] sm:$0xf0] }
 0x6af   : > { %1752 = vmatmul.msk.bf16.vlgmr.msrb.gmra.mxu2 %vm816_vm0, %v1033_v25  ;;  %v1767_v25 = vld [vmem:[%s2548_s29] sm:$0xf]  ;;  %1395 = vmatpush.bf16.msra.mxu0 %v1899_v38 }
 0x6b0   : > { %v1108_v62 = vpop.xlane.xlu1 %1107  ;;  %1265 = vmatpush.bf16.msrb.mxu3 %v1784_v53 }
 0x6b1   : > { %v1110_v63 = vsub.f32 %v1101_v48, %v1108_v62  ;;  %v1793_v48 = vld [vmem:[%s2548_s29 + $0x38] sm:$0xf0]  ;;  %v1884_v62 = vld [vmem:[%s2548_s29 + $0x4] sm:$0xf] }
 0x6b2   : > { %v1796_v49 = vor.u32 %v1890_v46, %v1793_v48 }
 0x6b3   : > { %v2045_v0 = vpop.eup %2044  ;;  %v1113_v1 = vmul.f32 1.442695, %v1110_v63 }
 0x6b4   : > { %v1115_v2 = vsel %vm816_vm0, %v2045_v0, 0.0  ;;  %1278 = vmatpush.bf16.msrb.mxu1 %v1796_v49  ;;  %1266 = vmatpush.bf16.msrb.mxu3 %v1776_v57 }
 0x6b5   : > { %2046 = vpow2.f32 %v1113_v1  ;;  %1116 = vadd.xlane.f32.xlu1 %v1115_v2  ;;  %v1769_v1 = vld [vmem:[%s2548_s29 + $0x8] sm:$0xf0] }
 0x6b6   : > { %v1772_v2 = vor.u32 %v1884_v62, %v1769_v1 }
 0x6b8   : > { %1279 = vmatpush.bf16.msrb.mxu1 %v1788_v30 }
 0x6bb   : > { %v2047_v3 = vpop.eup %2046 }
 0x6bc   : > { %v1118_v4 = vsel %vm816_vm0, %v2047_v3, 0.0  ;;  %v1121_v5 = vpack.c.bf16 %v2047_v3, %v2045_v0  ;;  %1280 = vmatpush.bf16.msrb.mxu1 %v1780_v59  ;;  %v1768_v0 = vor.u32 %v1885_v61, %v1767_v25 }
 0x6bd   : > { %1119 = vadd.xlane.f32.xlu0 %v1118_v4 }
 0x6be   : > { %1759 = vmatmul.msk.bf16.vlgmr.msrb.gmra.mxu0 %vm816_vm0, %v1121_v5  ;;  %1267 = vmatpush.bf16.msrb.mxu3 %v1768_v0 }
 0x6c0   : > { %1281 = vmatpush.bf16.msrb.mxu1 %v1772_v2 }
 0x719   : > { %v1029_v8 = vpop.xlane.xlu1 %1028 }
 0x71a   : > { %2048 = vrcp.f32 %v1029_v8 }
 0x720   : > { %v2049_v11 = vpop.eup %2048 }
 0x721   : > { %v1032_v9 = vpop.xlane.xlu0 %1031 }
 0x722   : > { %2050 = vrcp.f32 %v1032_v9 }
 0x728   : > { %v1117_v12 = vpop.xlane.xlu1 %1116  ;;  %v2051_v13 = vpop.eup %2050 }
 0x729   : > { %2052 = vrcp.f32 %v1117_v12 }
 0x72f   : > { %v2053_v23 = vpop.eup %2052 }
 0x730   : > { %v1120_v14 = vpop.xlane.xlu0 %1119 }
 0x731   : > { %2054 = vrcp.f32 %v1120_v14  ;;  %v1169_v14 = vld [vmem:[%s619_s0] sm:$0x1] }
 0x732   : > { %v1049_v10 = vpop.f32.mrf.mxu2 }
 0x733   : > { %v1056_v19 = vmul.f32 %v2049_v11, %v1049_v10 }
 0x737   : > { %v2055_v24 = vpop.eup %2054 }
 0x73a   : > { %v1051_v15 = vpop.f32.mrf.mxu2 }
 0x73b   : > { %v1057_v20 = vmul.f32 %v2051_v13, %v1051_v15  ;;  %v1134_v21 = vpop.f32.mrf.mxu0 }
 0x73c   : > { %v1141_v27 = vmul.f32 %v2053_v23, %v1134_v21  ;;  %v1204_v21 = vunpack.c.l.bf16 %v1169_v14 }
 0x73d   : > { %v1058_v22 = vpack.c.bf16 %v1057_v20, %v1056_v19 }
 0x73f   : > { %1757 = vmatmul.msk.bf16.vlgmr.msra.gmra.mxu3 %vm816_vm0, %v1058_v22 }
 0x743   : > { %v1136_v26 = vpop.f32.mrf.mxu0 }
 0x744   : > { %v1142_v28 = vmul.f32 %v2055_v24, %v1136_v26  ;;  %v1205_v26 = vperm.slane %v1204_v21, 0 }
 0x746   : > { %v1143_v29 = vpack.c.bf16 %v1142_v28, %v1141_v27 }
 0x748   : > { %1764 = vmatmul.msk.bf16.vlgmr.msra.gmra.mxu2 %vm816_vm0, %v1143_v29 }
 0x7c2   : > { %v1077_v32 = vpop.f32.mrf.mxu3 }
 0x7c3   : > { %v1082_v33 = vadd.f32 %v1077_v32, %v2638_v37 }
 0x7ca   : > { %v1079_v40 = vpop.f32.mrf.mxu3 }
 0x7cb   : > { %v1162_v34 = vpop.f32.mrf.mxu2  ;;  %v1083_v37 = vadd.f32 %v1079_v40, %v990_v42  ;;  %v1897_v40 = vld [vmem:[%s2553_s24 + $0x28] sm:$0xff]  ;;  %v1896_v42 = vld [vmem:[%s2553_s24 + $0x20] sm:$0xff] }
 0x7cc   : > { %v2663_v36 = vadd.f32 %v1162_v34, %v1082_v33 }
 0x7ce   : > { %v1170_v39 = vmul.f32 %v2663_v36, %v2663_v36 }
 0x7d0   : > { %v1172_v43 = vsel %vm673_vm8, %v1170_v39, 0.0  ;;  %v1898_v39 = vld [vmem:[%s2553_s24 + $0x30] sm:$0xff] }
 0x7d1   : > { %1173 = vadd.xlane.f32.xlu1 %v1172_v43  ;;  %1396 = vmatpush.bf16.msra.mxu0 %v1898_v39  ;;  %v1895_v43 = vld [vmem:[%s2553_s24 + $0x18] sm:$0xff] }
 0x7d3   : > { %v1164_v44 = vpop.f32.mrf.mxu2 }
 0x7d4   : > { %v2671_v45 = vadd.f32 %v1164_v44, %v1083_v37  ;;  %v1894_v37 = vld [vmem:[%s2553_s24 + $0x10] sm:$0xff] }
 0x7d5   : > { %1397 = vmatpush.bf16.msra.mxu0 %v1897_v40 }
 0x7d6   : > { %v1171_v18 = vmul.f32 %v2671_v45, %v2671_v45 }
 0x7d8   : > { %v1175_v17 = vsel %vm673_vm8, %v1171_v18, 0.0 }
 0x7d9   : > { %1176 = vadd.xlane.f32.xlu2 %v1175_v17  ;;  %1398 = vmatpush.bf16.msra.mxu0 %v1896_v42  ;;  %v1893_v17 = vld [vmem:[%s2553_s24 + $0x8] sm:$0xff]  ;;  %s2786_s24 = sld [smem:[#allocation22_spill]] (!%p1833_p1) }
 0x7dd   : > { %1399 = vmatpush.bf16.msra.mxu0 %v1895_v43 }
 0x7e1   : > { %1400 = vmatpush.bf16.msra.mxu0 %v1894_v37 }
 0x7e5   : > { %1401 = vmatpush.bf16.msra.mxu0 %v1893_v17 }
 0x7e9   : > { %1402 = vmatpush.bf16.msra.mxu0 %v1892_v16 }
 0x844   : > { %v1174_v60 = vpop.xlane.xlu1 %1173 }
 0x845   : > { %v1178_v63 = vmul.f32 %v1174_v60, %v2579_v31 }
 0x847   : > { %v1180_v3 = vadd.f32 1e-06, %v1178_v63 }
 0x849   : > { %2056 = vrsqrt.f32 %v1180_v3  ;;  %vm1188_vm2 = vweird.f32 %v1180_v3 }
 0x84c   : > { %v1177_v4 = vpop.xlane.xlu2 %1176 }
 0x84d   : > { %v1179_v5 = vmul.f32 %v1177_v4, %v2579_v31 }
 0x84f   : > { %v2057_v6 = vpop.eup %2056  ;;  %v1181_v7 = vadd.f32 1e-06, %v1179_v5 }
 0x850   : > { %v1183_v8 = vmul.f32 %v2057_v6, %v1180_v3  ;;  %vm1189_vm1 = vweird.f32 %v2057_v6 }
 0x851   : > { %2058 = vrsqrt.f32 %v1181_v7  ;;  %vm1190_vm3 = vmor %vm1188_vm2, %vm1189_vm1  ;;  %vm1198_vm5 = vweird.f32 %v1181_v7 }
 0x852   : > { %v1184_v9 = vmul.f32 %v2057_v6, %v1183_v8 }
 0x854   : > { %v1185_v10 = vmul.f32 0.5, %v1184_v9 }
 0x856   : > { %v1186_v11 = vsub.f32 1.5, %v1185_v10 }
 0x857   : > { %v2059_v12 = vpop.eup %2058 }
 0x858   : > { %v1193_v13 = vmul.f32 %v2059_v12, %v1181_v7  ;;  %v1187_v15 = vmul.f32 %v2057_v6, %v1186_v11  ;;  %vm1199_vm4 = vweird.f32 %v2059_v12 }
 0x859   : > { %vm1200_vm6 = vmor %vm1198_vm5, %vm1199_vm4 }
 0x85a   : > { %v1194_v19 = vmul.f32 %v2059_v12, %v1193_v13  ;;  %v1191_v22 = vsel %vm1190_vm3, %v2057_v6, %v1187_v15 }
 0x85b   : > { %v1202_v27 = vmul.f32 %v1191_v22, %v2663_v36 }
 0x85c   : > { %v1195_v20 = vmul.f32 0.5, %v1194_v19 }
 0x85d   : > { %v1206_v32 = vmul.f32 %v1205_v26, %v1202_v27 }
 0x85e   : > { %v1196_v23 = vsub.f32 1.5, %v1195_v20 }
 0x860   : > { %v1197_v24 = vmul.f32 %v2059_v12, %v1196_v23 }
 0x862   : > { %v1201_v28 = vsel %vm1200_vm6, %v2059_v12, %v1197_v24 }
 0x863   : > { %v1203_v29 = vmul.f32 %v1201_v28, %v2671_v45 }
 0x865   : > { %v1207_v33 = vmul.f32 %v1205_v26, %v1203_v29 }
 0x867   : > { %v1208_v34 = vpack.c.bf16 %v1207_v33, %v1206_v32 }
 0x869   : > { %1797 = vmatmul.msk.bf16.vlgmr.msrb.gmra.mxu3 %vm673_vm8, %v1208_v34  ;;  %1798 = vmatmul.msk.bf16.vlgmr.msrb.gmra.mxu1 %vm673_vm8, %v1208_v34 }
 0x8e6   : > { %v1283_v58 = vpop.f32.mrf.mxu1 }
 0x8ec   : > { %v1269_v44 = vpop.f32.mrf.mxu3 }
 0x8ed   : > { %v1799_v18 = vmul.f32 -1.442695, %v1269_v44 }
 0x8ee   : > { %v1285_v7 = vpop.f32.mrf.mxu1 }
 0x8ef   : > { %2060 = vpow2.f32 %v1799_v18 }
 0x8f4   : > { %v1271_v41 = vpop.f32.mrf.mxu3 }
 0x8f5   : > { %v2061_v46 = vpop.eup %2060  ;;  %v1800_v47 = vmul.f32 -1.442695, %v1271_v41 }
 0x8f6   : > { %v1294_v48 = vadd.f32 1.0, %v2061_v46 }
 0x8f7   : > { %2062 = vpow2.f32 %v1800_v47 }
 0x8f8   : > { %2064 = vrcp.f32 %v1294_v48  ;;  %v1307_v56 = vand.u32 2147483648, %v1294_v48  ;;  %vm1301_vm9 = vweird.f32 %v1294_v48  ;;  %v1305_v35 = vand.u32 2147483647, %v1294_v48 }
 0x8fa   : > { %v1308_v25 = vor.u32 1.1754944e-38, %v1307_v56  ;;  %vm1306_vm11 = vcmp.eq.f32.partialorder %v1305_v35, 8.507059e+37 }
 0x8fd   : > { %v2063_v49 = vpop.eup %2062 }
 0x8fe   : > { %v2065_v50 = vpop.eup %2064  ;;  %v1295_v51 = vadd.f32 1.0, %v2063_v49 }
 0x8ff   : > { %v1297_v52 = vmul.f32 %v2065_v50, %v1294_v48  ;;  %vm1302_vm7 = vweird.f32 %v2065_v50 }
 0x900   : > { %2066 = vrcp.f32 %v1295_v51  ;;  %vm1303_vm10 = vmor %vm1301_vm9, %vm1302_vm7  ;;  %v1322_v61 = vand.u32 2147483648, %v1295_v51  ;;  %v1320_v63 = vand.u32 2147483647, %v1295_v51  ;;  %vm1316_vm13 = vweird.f32 %v1295_v51 }
 0x901   : > { %v1298_v53 = vsub.f32 1.0, %v1297_v52 }
 0x902   : > { %v1323_v2 = vor.u32 1.1754944e-38, %v1322_v61  ;;  %vm1321_vm15 = vcmp.eq.f32.partialorder %v1320_v63, 8.507059e+37 }
 0x903   : > { %v1299_v54 = vmul.f32 %v2065_v50, %v1298_v53 }
 0x905   : > { %v1300_v30 = vadd.f32 %v2065_v50, %v1299_v54 }
 0x906   : > { %v2067_v55 = vpop.eup %2066 }
 0x907   : > { %v1312_v57 = vmul.f32 %v2067_v55, %v1295_v51  ;;  %v1304_v59 = vsel %vm1303_vm10, %v2065_v50, %v1300_v30  ;;  %vm1317_vm12 = vweird.f32 %v2067_v55 }
 0x908   : > { %v1309_v0 = vsel %vm1306_vm11, %v1308_v25, %v1304_v59  ;;  %vm1318_vm14 = vmor %vm1316_vm13, %vm1317_vm12 }
 0x909   : > { %v1313_v60 = vsub.f32 1.0, %v1312_v57  ;;  %v1326_v3 = vmul.f32 %v1309_v0, %v1269_v44 }
 0x90b   : > { %v1314_v62 = vmul.f32 %v2067_v55, %v1313_v60  ;;  %v1328_v8 = vmul.f32 %v1326_v3, %v1283_v58 }
 0x90d   : > { %v1315_v1 = vadd.f32 %v2067_v55, %v1314_v62 }
 0x90f   : > { %v1319_v4 = vsel %vm1318_vm14, %v2067_v55, %v1315_v1 }
 0x910   : > { %v1324_v5 = vsel %vm1321_vm15, %v1323_v2, %v1319_v4 }
 0x911   : > { %v1327_v6 = vmul.f32 %v1324_v5, %v1271_v41 }
 0x913   : > { %v1329_v9 = vmul.f32 %v1327_v6, %v1285_v7 }
 0x915   : > { %v1330_v10 = vpack.c.bf16 %v1329_v9, %v1328_v8 }
 0x917   : > { %1403 = vmatmul.bf16.vlgmr.msra.gmra.mxu0 %v1330_v10 }
 0x994   : > { %v1404_v11 = vpop.f32.mrf.mxu0 }
 0x995   : > { %v1409_v12 = vadd.f32 %v1404_v11, %v2663_v36 }
 0x997   : > { %1411 = vst.msk [vmem:[#allocation2] sm:$0xff] %vm673_vm8, %v1409_v12 }
 0x99b   : > { %1416 = sbr.rel (%p1833_p1) target bundleno = 2756 (0xac4), region = 104 }
 0x99c   : > { %v1406_v13 = vpop.f32.mrf.mxu0 }
 0x99d   : > { %v1410_v14 = vadd.f32 %v1406_v13, %v2671_v45 }
 0x99f   : > { %1412 = vst.msk [vmem:[#allocation2 + $0x8] sm:$0xff] %vm673_vm8, %v1410_v14 }
 0x9a0   : > { %v2716_v15 = vld [vmem:[#allocation2] sm:$0xff]  ;;  %v1860_v22 = vld [vmem:[#allocation12 + $0x30] sm:$0xf]  ;;  %v1906_v24 = vld [vmem:[#allocation12 + $0x34] sm:$0xf] }
 0x9a1   : > { %v1420_v19 = vmul.f32 %v2716_v15, %v2716_v15  ;;  %v1907_v23 = vld [vmem:[#allocation12 + $0x34] sm:$0xf0]  ;;  %v1862_v27 = vld [vmem:[#allocation12 + $0x38] sm:$0xf0]  ;;  %v1852_v29 = vld [vmem:[#allocation12 + $0x20] sm:$0xf] }
 0x9a2   : > { %v1861_v26 = vor.u32 %v1907_v23, %v1860_v22  ;;  %v1865_v28 = vor.u32 %v1906_v24, %v1862_v27  ;;  %v1905_v32 = vld [vmem:[#allocation12 + $0x24] sm:$0xf0]  ;;  %v1904_v33 = vld [vmem:[#allocation12 + $0x24] sm:$0xf]  ;;  %v1854_v38 = vld [vmem:[#allocation12 + $0x28] sm:$0xf0] }
 0x9a3   : > { %v1422_v21 = vsel %vm673_vm8, %v1420_v19, 0.0  ;;  %v1853_v34 = vor.u32 %v1905_v32, %v1852_v29  ;;  %v1857_v39 = vor.u32 %v1904_v33, %v1854_v38  ;;  %v1844_v40 = vld [vmem:[#allocation12 + $0x10] sm:$0xf]  ;;  %v1903_v42 = vld [vmem:[#allocation12 + $0x14] sm:$0xf0] }
 0x9a4   : > { %1423 = vadd.xlane.f32.xlu0 %v1422_v21  ;;  %1514 = vmatpush.bf16.msra.mxu0 %v1861_v26  ;;  %v1902_v43 = vld [vmem:[#allocation12 + $0x14] sm:$0xf]  ;;  %v1845_v37 = vor.u32 %v1903_v42, %v1844_v40  ;;  %v1846_v44 = vld [vmem:[#allocation12 + $0x18] sm:$0xf0]  ;;  %v1836_v18 = vld [vmem:[#allocation12] sm:$0xf] }
 0x9a5   : > { %1528 = vmatpush.bf16.msra.mxu1 %v1865_v28  ;;  %v1901_v17 = vld [vmem:[#allocation12 + $0x4] sm:$0xf0]  ;;  %v1849_v16 = vor.u32 %v1902_v43, %v1846_v44  ;;  %v1900_v41 = vld [vmem:[#allocation12 + $0x4] sm:$0xf]  ;;  %v1838_v46 = vld [vmem:[#allocation12 + $0x8] sm:$0xf0] }
 0x9a6   : > { %v2720_v20 = vld [vmem:[#allocation2 + $0x8] sm:$0xff]  ;;  %v1837_v47 = vor.u32 %v1901_v17, %v1836_v18  ;;  %v1841_v48 = vor.u32 %v1900_v41, %v1838_v46  ;;  %v1419_v61 = vld [vmem:[%s2786_s24] sm:$0x1] }
 0x9a7   : > { %v1421_v36 = vmul.f32 %v2720_v20, %v2720_v20 }
 0x9a8   : > { %1515 = vmatpush.bf16.msra.mxu0 %v1853_v34 }
 0x9a9   : > { %v1425_v45 = vsel %vm673_vm8, %v1421_v36, 0.0  ;;  %1529 = vmatpush.bf16.msra.mxu1 %v1857_v39 }
 0x9ac   : > { %1426 = vadd.xlane.f32.xlu0 %v1425_v45  ;;  %1516 = vmatpush.bf16.msra.mxu0 %v1845_v37 }
 0x9ad   : > { %1530 = vmatpush.bf16.msra.mxu1 %v1849_v16 }
 0x9b0   : > { %1517 = vmatpush.bf16.msra.mxu0 %v1837_v47 }
 0x9b1   : > { %1531 = vmatpush.bf16.msra.mxu1 %v1841_v48 }
 0xa17   : > { %v1424_v49 = vpop.xlane.xlu0 %1423 }
 0xa18   : > { %v1428_v50 = vmul.f32 %v1424_v49, %v2579_v31 }
 0xa1a   : > { %v1430_v51 = vadd.f32 1e-06, %v1428_v50 }
 0xa1c   : > { %2068 = vrsqrt.f32 %v1430_v51  ;;  %vm1438_vm1 = vweird.f32 %v1430_v51 }
 0xa1f   : > { %v1427_v52 = vpop.xlane.xlu0 %1426 }
 0xa20   : > { %v1429_v53 = vmul.f32 %v1427_v52, %v2579_v31  ;;  %v1454_v31 = vunpack.c.l.bf16 %v1419_v61 }
 0xa22   : > { %v2069_v54 = vpop.eup %2068  ;;  %v1431_v30 = vadd.f32 1e-06, %v1429_v53  ;;  %v1455_v3 = vperm.slane %v1454_v31, 0 }
 0xa23   : > { %v1433_v55 = vmul.f32 %v2069_v54, %v1430_v51  ;;  %vm1439_vm0 = vweird.f32 %v2069_v54 }
 0xa24   : > { %2070 = vrsqrt.f32 %v1431_v30  ;;  %vm1440_vm2 = vmor %vm1438_vm1, %vm1439_vm0  ;;  %vm1448_vm4 = vweird.f32 %v1431_v30 }
 0xa25   : > { %v1434_v56 = vmul.f32 %v2069_v54, %v1433_v55 }
 0xa27   : > { %v1435_v35 = vmul.f32 0.5, %v1434_v56 }
 0xa29   : > { %v1436_v57 = vsub.f32 1.5, %v1435_v35 }
 0xa2a   : > { %v2071_v58 = vpop.eup %2070 }
 0xa2b   : > { %v1443_v59 = vmul.f32 %v2071_v58, %v1431_v30  ;;  %v1437_v60 = vmul.f32 %v2069_v54, %v1436_v57  ;;  %vm1449_vm3 = vweird.f32 %v2071_v58 }
 0xa2c   : > { %vm1450_vm5 = vmor %vm1448_vm4, %vm1449_vm3 }
 0xa2d   : > { %v1444_v25 = vmul.f32 %v2071_v58, %v1443_v59  ;;  %v1441_v0 = vsel %vm1440_vm2, %v2069_v54, %v1437_v60 }
 0xa2e   : > { %v1452_v2 = vmul.f32 %v1441_v0, %v2716_v15 }
 0xa2f   : > { %v1445_v62 = vmul.f32 0.5, %v1444_v25 }
 0xa30   : > { %v1456_v6 = vmul.f32 %v1455_v3, %v1452_v2 }
 0xa31   : > { %v1446_v63 = vsub.f32 1.5, %v1445_v62 }
 0xa33   : > { %v1447_v1 = vmul.f32 %v2071_v58, %v1446_v63 }
 0xa35   : > { %v1451_v4 = vsel %vm1450_vm5, %v2071_v58, %v1447_v1 }
 0xa36   : > { %v1453_v5 = vmul.f32 %v1451_v4, %v2720_v20 }
 0xa38   : > { %v1457_v7 = vmul.f32 %v1455_v3, %v1453_v5 }
 0xa3a   : > { %v1458_v8 = vpack.c.bf16 %v1457_v7, %v1456_v6 }
 0xa3c   : > { %1866 = vmatmul.msk.bf16.vlgmr.msra.gmra.mxu0 %vm673_vm8, %v1458_v8  ;;  %1867 = vmatmul.msk.bf16.vlgmr.msra.gmra.mxu1 %vm673_vm8, %v1458_v8 }
 0xab9   : > { %v1519_v9 = vpop.f32.mrf.mxu0  ;;  %v1533_v10 = vpop.f32.mrf.mxu1 }
 0xaba   : > { %1538 = vst [vmem:[#allocation13] sm:$0xff] %v1519_v9 }
 0xabb   : > { %1539 = vst [vmem:[#allocation13 + $0x8] sm:$0xff] %v1533_v10 }
 0xac1   : > { %v1521_v11 = vpop.f32.mrf.mxu0  ;;  %v1535_v12 = vpop.f32.mrf.mxu1 }
 0xac2   : > { %1540 = vst [vmem:[#allocation13 + $0x10] sm:$0xff] %v1521_v11 }
 0xac3   : > { %1541 = vst [vmem:[#allocation13 + $0x18] sm:$0xff] %v1535_v12 }
 0xac4 PF: > { %p1960_p4 = scmp.eq.s32.totalorder %s2418_s17, 1  ;;  %s2322_s13 = smov [#allocation13]  }
 0xac5   : > { %s1547_s22 = sshll.u32 %s2322_s13, 4  ;;  %s2787_s14 = sld [smem:[#allocation24_spill]]  ;;  %s1548_s22 = int_to_ptr.vmem [resolvable:$true] %s1547_s22 }
 0xac6   : > { %s2323_s28 = smov 256  }
 0xacb   : > { %s1549_s20 = sshll.u32 %s2787_s14, 4  ;;  %s1550_s20 = int_to_ptr.hbm [resolvable:$true] %s1549_s20 }
 0xacc   : > { %1931 = dma.vmem_to_hbm [thread:$0]  (%p1960_p4), %s1548_s22, 512, %s1550_s20, [#allocation6], %s2323_s28, %s2323_s28, %s2321_s18  }
 0xacd   : > { %2283 = dma.done.wait (%p1960_p4), [#allocation6], 512  }
 0xace   : > { %2285 = vsyncadd (%p1960_p4), [#allocation6], 4294966784 }
 0xacf PF: > { %p27_p5 = scmp.ge.s32.totalorder %s2467_s26, 4   ;;  %s2788_s29 = smov %s2292_s30 }
 0xad0   : > { %s2789_s30 = smov %s2296_s15  ;;  %s2790_s15 = smov %s2478_s12 }
 0xad1   : > { %s2791_s16 = smov %s2467_s26  ;;  %29 = sbr.rel (!%p27_p5) target bundleno = 13 (0xd), region = 153 }
 0xad6   :  { %1566 = vsyncpa [#allocation5], 1 }
 0xad7   :  { %1568 = vsyncpa [#allocation5 + $0x1], 1 }
 0xad8   :  { %1569 = vsyncpa [#allocation8], 1 }
 0xad9   :  { %1570 = vsyncpa [#allocation11], 1 }
 0xada   :  { %1572 = vsyncpa [#allocation11 + $0x1], 1 }
 0xadb   :  { %1573 = vsyncpa [#allocation6], 1 }
 0xadc   :  { %1575 = vsyncpa [#allocation6 + $0x1], 1 }

</bundles_post_ra>
